<compile_context>
chip_gen: v7x
topology: tpu7x:2x2x1
jax: 0.10.0
libtpu: 0.0.40
codegen_flags: <defaults>
</compile_context>

<pallas_src>
import jax
import jax.numpy as jnp
from jax.experimental import pallas as pl
from jax.experimental.pallas import tpu as pltpu

NEG_SLOPE = 0.01  # nn.LeakyReLU default negative_slope


def _leaky_relu(x):
    # max(x, 0.01*x): one mul + one max instead of cmp + mul + select.
    return jnp.maximum(x, NEG_SLOPE * x)


def _smile_kernel(x_ref, adj_ref,
                  w1c_ref, b1_ref,
                  w2c_ref, b2_ref,
                  w3c_ref, b3_ref,
                  wg_ref, bg_ref,
                  wf1_ref, bf1_ref,
                  wf2_ref, bf2_ref,
                  out_ref):
    # One program == one graph (block-diagonal batched adjacency).
    adj = adj_ref[0]          # (npg, npg) bf16, row-normalized
    x = x_ref[...]            # (npg, F)   bf16

    def sage(h_bf16, wc_ref, b_ref):
        # SAGEConv('mean'):  (A@h) @ W_neigh + h @ W_root + b
        # computed as two summed dots against static slices of the
        # pre-concatenated weight (no (npg, 2*din) hcat buffer).
        din = h_bf16.shape[-1]
        neigh = jnp.dot(adj, h_bf16, preferred_element_type=jnp.float32)
        z = (jnp.dot(neigh.astype(jnp.bfloat16), wc_ref[:din],
                     preferred_element_type=jnp.float32)
             + jnp.dot(h_bf16, wc_ref[din:],
                       preferred_element_type=jnp.float32)
             + b_ref[...])
        return _leaky_relu(z)                              # f32 elementwise

    h = sage(x, w1c_ref, b1_ref)                           # (npg, 2F) f32
    h = sage(h.astype(jnp.bfloat16), w2c_ref, b2_ref)      # (npg, 2F) f32
    h = sage(h.astype(jnp.bfloat16), w3c_ref, b3_ref)      # (npg, 4F) f32

    # gmp over this graph's nodes: single sublane (XLU) max reduce.
    pooled = jnp.max(h, axis=0, keepdims=True)             # (1, 4F) f32

    # mol_fc_g1 -> Dropout(identity) -> fc[Linear, LeakyReLU, Dropout, Linear]
    # M=1 dense tail: negligible FLOPs, kept in f32 for precision.
    z = jnp.dot(pooled, wg_ref[...], preferred_element_type=jnp.float32) + bg_ref[...]
    z = jnp.dot(z, wf1_ref[...], preferred_element_type=jnp.float32) + bf1_ref[...]
    z = _leaky_relu(z)
    z = jnp.dot(z, wf2_ref[...], preferred_element_type=jnp.float32) + bf2_ref[...]
    out_ref[...] = z[None].astype(out_ref.dtype)           # lane-dense (1,1,128)


def smile_forward(x, adj_blocks, params):
    """x: (N, F) node features; adj_blocks: (B, npg, npg) per-graph
    row-normalized adjacency blocks (contiguous, equal-sized graphs)."""
    N, F = x.shape
    B, npg, _ = adj_blocks.shape
    assert N == B * npg, "equal-sized contiguous graphs assumed"

    bf16 = jnp.bfloat16

    # Lane-dense output: pad the final Linear to a multiple of 128 columns and
    # slice back after the kernel.
    n_output = params["bf2"].shape[1]
    out_cols = max(128, -(-n_output // 128) * 128)
    pad = out_cols - n_output
    wf2 = jnp.pad(params["wf2"], ((0, 0), (0, pad)))
    bf2 = jnp.pad(params["bf2"], ((0, 0), (0, pad)))

    # bf16 operands for the MXU-heavy conv phase; biases / dense tail stay f32.
    args = (x.astype(bf16), adj_blocks.astype(bf16),
            params["w1c"].astype(bf16), params["b1"],
            params["w2c"].astype(bf16), params["b2"],
            params["w3c"].astype(bf16), params["b3"],
            params["wg"], params["bg"],
            params["wf1"], params["bf1"],
            wf2, bf2)

    # Weights/biases: constant index maps -> VMEM-resident, fetched once.
    def resident(a):
        return pl.BlockSpec(a.shape, lambda b, _nd=a.ndim: (0,) * _nd)

    in_specs = [
        pl.BlockSpec((npg, F), lambda b: (b, 0)),           # per-graph node rows
        pl.BlockSpec((1, npg, npg), lambda b: (b, 0, 0)),   # per-graph adj block
    ] + [resident(a) for a in args[2:]]

    out = pl.pallas_call(
        _smile_kernel,
        grid=(B,),
        in_specs=in_specs,
        out_specs=pl.BlockSpec((1, 1, out_cols), lambda b: (b, 0, 0)),
        out_shape=jax.ShapeDtypeStruct((B, 1, out_cols), jnp.float32),
        # Per-step footprint (one (npg,npg) tile + <0.5 MiB of weights) is far
        # below the default scoped-VMEM limit on every generation, so no
        # vmem_limit_bytes override (and never the full 64 MiB of v7x).
        compiler_params=pltpu.CompilerParams(
            dimension_semantics=("parallel",)),
    )(*args)
    return out[:, 0, :n_output]


def init_params(key, F, hidden, n_output):
    ks = iter(jax.random.split(key, 12))

    def w(shape, scale=0.05):
        return scale * jax.random.normal(next(ks), shape, dtype=jnp.float32)

    # Dense weights stored (in, out); SAGE weight pairs stored pre-concatenated
    # along the contraction dim: w*c = concat([W_neigh, W_root], axis=0).
    return dict(
        w1c=w((2 * F, 2 * F)), b1=w((1, 2 * F)),
        w2c=w((4 * F, 2 * F)), b2=w((1, 2 * F)),
        w3c=w((4 * F, 4 * F)), b3=w((1, 4 * F)),
        wg=w((4 * F, hidden)), bg=w((1, hidden)),
        wf1=w((hidden, 128)), bf1=w((1, 128)),
        wf2=w((128, n_output)), bf2=w((1, n_output)),
    )


def _reference(x, adj_full, mask_nb, params):
    # Pure-JAX f32 reference: unfused two-matmul SAGE on the full dense
    # adjacency + mask-based gmp.  Independently checks the weight-concat
    # split, the per-graph adjacency tiling, and the fused pooling/FC tail.
    def sage(h, wc, b):
        din = h.shape[-1]
        wn, wr = wc[:din], wc[din:]
        return _leaky_relu(adj_full @ h @ wn + h @ wr + b)

    h = sage(x, params["w1c"], params["b1"])
    h = sage(h, params["w2c"], params["b2"])
    h = sage(h, params["w3c"], params["b3"])
    big_neg = jnp.float32(-1e30)
    pooled = jnp.stack(
        [jnp.max(jnp.where(mask_nb[:, g:g + 1] > 0, h, big_neg), axis=0)
         for g in range(mask_nb.shape[1])], axis=0)
    z = pooled @ params["wg"] + params["bg"]
    z = _leaky_relu(z @ params["wf1"] + params["bf1"])
    return z @ params["wf2"] + params["bf2"]


if __name__ == "__main__":
    key = jax.random.PRNGKey(0)
    k_x, k_p = jax.random.split(key)

    # Small synthetic molecular batch: B=2 graphs of 16 nodes each (N=32),
    # num_features_mol scaled down to 64, hidden_state=128, n_output=2.
    N, B, F, hidden, n_output = 32, 2, 64, 128, 2
    npg = N // B
    x = jax.random.normal(k_x, (N, F), dtype=jnp.float32)

    # Deterministic edge_index: bidirectional ring inside each graph.
    src, dst = [], []
    for g in range(B):
        base = g * npg
        for i in range(npg):
            a = base + i
            c = base + (i + 1) % npg
            src += [a, c]
            dst += [c, a]
    src = jnp.array(src, dtype=jnp.int32)
    dst = jnp.array(dst, dtype=jnp.int32)

    # Dense row-normalized adjacency for 'mean' aggregation (glue, not hot
    # path).  The batched graph is block-diagonal, so the kernel only ever
    # sees the (B, npg, npg) diagonal blocks.
    A = jnp.zeros((N, N), dtype=jnp.float32).at[dst, src].set(1.0)
    deg = jnp.sum(A, axis=1, keepdims=True)
    adj_full = A / jnp.maximum(deg, 1.0)
    adj_blocks = jnp.stack(
        [adj_full[g * npg:(g + 1) * npg, g * npg:(g + 1) * npg] for g in range(B)])

    # One-hot graph membership mask (only used by the pure-JAX reference).
    batch = jnp.repeat(jnp.arange(B, dtype=jnp.int32), npg)
    mask_nb = (batch[:, None] == jnp.arange(B)[None, :]).astype(jnp.float32)

    params = init_params(k_p, F, hidden, n_output)

    out = smile_forward(x, adj_blocks, params)
    out = jax.block_until_ready(out)

    ref = _reference(x, adj_full, mask_nb, params)
    assert out.shape == (B, n_output)
    # Tolerance loosened vs the pure-f32 version: the conv matmuls now feed
    # the MXU bf16 operands (with f32 accumulation).
    assert jnp.allclose(out, ref, atol=2e-2, rtol=2e-2), (out, ref)

    print("KERNEL_OK")
</pallas_src>

<mosaic_0001>
module attributes {stable_mosaic.version = 11 : i64} {
  func.func @_smile_kernel(%arg0: i32, %arg1: memref<16x64xbf16, #tpu.memory_space<vmem>>, %arg2: memref<1x16x16xbf16, #tpu.memory_space<vmem>>, %arg3: memref<128x128xbf16, #tpu.memory_space<vmem>>, %arg4: memref<1x128xf32, #tpu.memory_space<vmem>>, %arg5: memref<256x128xbf16, #tpu.memory_space<vmem>>, %arg6: memref<1x128xf32, #tpu.memory_space<vmem>>, %arg7: memref<256x256xbf16, #tpu.memory_space<vmem>>, %arg8: memref<1x256xf32, #tpu.memory_space<vmem>>, %arg9: memref<256x128xf32, #tpu.memory_space<vmem>>, %arg10: memref<1x128xf32, #tpu.memory_space<vmem>>, %arg11: memref<128x128xf32, #tpu.memory_space<vmem>>, %arg12: memref<1x128xf32, #tpu.memory_space<vmem>>, %arg13: memref<128x128xf32, #tpu.memory_space<vmem>>, %arg14: memref<1x128xf32, #tpu.memory_space<vmem>>, %arg15: memref<1x1x128xf32, #tpu.memory_space<vmem>>) attributes {dimension_semantics = [#tpu.dimension_semantics<parallel>], iteration_bounds = array<i64: 2>, scalar_prefetch = 0 : i64, scratch_operands = 0 : i64, tpu.core_type = #tpu.core_type<tc>, window_params = [{transform_indices = @transform_0, window_bounds = array<i64: 16, 64>}, {transform_indices = @transform_1, window_bounds = array<i64: 1, 16, 16>}, {pipeline_mode = #tpu.pipeline_mode<synchronous>, transform_indices = @transform_2, window_bounds = array<i64: 128, 128>}, {pipeline_mode = #tpu.pipeline_mode<synchronous>, transform_indices = @transform_3, window_bounds = array<i64: 1, 128>}, {pipeline_mode = #tpu.pipeline_mode<synchronous>, transform_indices = @transform_4, window_bounds = array<i64: 256, 128>}, {pipeline_mode = #tpu.pipeline_mode<synchronous>, transform_indices = @transform_5, window_bounds = array<i64: 1, 128>}, {pipeline_mode = #tpu.pipeline_mode<synchronous>, transform_indices = @transform_6, window_bounds = array<i64: 256, 256>}, {pipeline_mode = #tpu.pipeline_mode<synchronous>, transform_indices = @transform_7, window_bounds = array<i64: 1, 256>}, {pipeline_mode = #tpu.pipeline_mode<synchronous>, transform_indices = @transform_8, window_bounds = array<i64: 256, 128>}, {pipeline_mode = #tpu.pipeline_mode<synchronous>, transform_indices = @transform_9, window_bounds = array<i64: 1, 128>}, {pipeline_mode = #tpu.pipeline_mode<synchronous>, transform_indices = @transform_10, window_bounds = array<i64: 128, 128>}, {pipeline_mode = #tpu.pipeline_mode<synchronous>, transform_indices = @transform_11, window_bounds = array<i64: 1, 128>}, {pipeline_mode = #tpu.pipeline_mode<synchronous>, transform_indices = @transform_12, window_bounds = array<i64: 128, 128>}, {pipeline_mode = #tpu.pipeline_mode<synchronous>, transform_indices = @transform_13, window_bounds = array<i64: 1, 128>}, {transform_indices = @transform_14, window_bounds = array<i64: 1, 1, 128>}]} {
    %c0 = arith.constant 0 : index
    %c0_0 = arith.constant 0 : index
    %c0_1 = arith.constant 0 : index
    %0 = vector.load %arg2[%c0, %c0_0, %c0_1] : memref<1x16x16xbf16, #tpu.memory_space<vmem>>, vector<1x16x16xbf16>
    %1 = vector.shape_cast %0 : vector<1x16x16xbf16> to vector<16x16xbf16>
    %c0_2 = arith.constant 0 : index
    %c0_3 = arith.constant 0 : index
    %2 = vector.load %arg1[%c0_2, %c0_3] : memref<16x64xbf16, #tpu.memory_space<vmem>>, vector<16x64xbf16>
    %cst = arith.constant dense<0.000000e+00> : vector<16x64xf32>
    %3 = tpu.matmul %1, %2, %cst {dimension_numbers = #tpu.dot_dimension_numbers<[1], [0], [0], [1], [0, 0, 1, 1], [], []>} : vector<16x16xbf16>, vector<16x64xbf16>, vector<16x64xf32> -> vector<16x64xf32>
    %4 = arith.truncf %3 : vector<16x64xf32> to vector<16x64xbf16>
    %c0_4 = arith.constant 0 : index
    %c0_5 = arith.constant 0 : index
    %5 = vector.load %arg3[%c0_4, %c0_5] : memref<128x128xbf16, #tpu.memory_space<vmem>>, vector<64x128xbf16>
    %cst_6 = arith.constant dense<0.000000e+00> : vector<16x128xf32>
    %6 = tpu.matmul %4, %5, %cst_6 {dimension_numbers = #tpu.dot_dimension_numbers<[1], [0], [0], [1], [0, 0, 1, 1], [], []>} : vector<16x64xbf16>, vector<64x128xbf16>, vector<16x128xf32> -> vector<16x128xf32>
    %c64 = arith.constant 64 : index
    %c0_7 = arith.constant 0 : index
    %7 = vector.load %arg3[%c64, %c0_7] : memref<128x128xbf16, #tpu.memory_space<vmem>>, vector<64x128xbf16>
    %cst_8 = arith.constant dense<0.000000e+00> : vector<16x128xf32>
    %8 = tpu.matmul %2, %7, %cst_8 {dimension_numbers = #tpu.dot_dimension_numbers<[1], [0], [0], [1], [0, 0, 1, 1], [], []>} : vector<16x64xbf16>, vector<64x128xbf16>, vector<16x128xf32> -> vector<16x128xf32>
    %9 = arith.addf %6, %8 : vector<16x128xf32>
    %c0_9 = arith.constant 0 : index
    %c0_10 = arith.constant 0 : index
    %10 = vector.load %arg4[%c0_9, %c0_10] : memref<1x128xf32, #tpu.memory_space<vmem>>, vector<1x128xf32>
    %11 = vector.broadcast %10 : vector<1x128xf32> to vector<16x128xf32>
    %12 = arith.addf %9, %11 : vector<16x128xf32>
    %cst_11 = arith.constant 0.00999999977 : f32
    %13 = vector.broadcast %cst_11 : f32 to vector<16x128xf32>
    %14 = arith.mulf %13, %12 : vector<16x128xf32>
    %15 = arith.maximumf %12, %14 : vector<16x128xf32>
    %16 = arith.truncf %15 : vector<16x128xf32> to vector<16x128xbf16>
    %cst_12 = arith.constant dense<0.000000e+00> : vector<16x128xf32>
    %17 = tpu.matmul %1, %16, %cst_12 {dimension_numbers = #tpu.dot_dimension_numbers<[1], [0], [0], [1], [0, 0, 1, 1], [], []>} : vector<16x16xbf16>, vector<16x128xbf16>, vector<16x128xf32> -> vector<16x128xf32>
    %18 = arith.truncf %17 : vector<16x128xf32> to vector<16x128xbf16>
    %c0_13 = arith.constant 0 : index
    %c0_14 = arith.constant 0 : index
    %19 = vector.load %arg5[%c0_13, %c0_14] : memref<256x128xbf16, #tpu.memory_space<vmem>>, vector<128x128xbf16>
    %cst_15 = arith.constant dense<0.000000e+00> : vector<16x128xf32>
    %20 = tpu.matmul %18, %19, %cst_15 {dimension_numbers = #tpu.dot_dimension_numbers<[1], [0], [0], [1], [0, 0, 1, 1], [], []>} : vector<16x128xbf16>, vector<128x128xbf16>, vector<16x128xf32> -> vector<16x128xf32>
    %c128 = arith.constant 128 : index
    %c0_16 = arith.constant 0 : index
    %21 = vector.load %arg5[%c128, %c0_16] : memref<256x128xbf16, #tpu.memory_space<vmem>>, vector<128x128xbf16>
    %cst_17 = arith.constant dense<0.000000e+00> : vector<16x128xf32>
    %22 = tpu.matmul %16, %21, %cst_17 {dimension_numbers = #tpu.dot_dimension_numbers<[1], [0], [0], [1], [0, 0, 1, 1], [], []>} : vector<16x128xbf16>, vector<128x128xbf16>, vector<16x128xf32> -> vector<16x128xf32>
    %23 = arith.addf %20, %22 : vector<16x128xf32>
    %c0_18 = arith.constant 0 : index
    %c0_19 = arith.constant 0 : index
    %24 = vector.load %arg6[%c0_18, %c0_19] : memref<1x128xf32, #tpu.memory_space<vmem>>, vector<1x128xf32>
    %25 = vector.broadcast %24 : vector<1x128xf32> to vector<16x128xf32>
    %26 = arith.addf %23, %25 : vector<16x128xf32>
    %cst_20 = arith.constant 0.00999999977 : f32
    %27 = vector.broadcast %cst_20 : f32 to vector<16x128xf32>
    %28 = arith.mulf %27, %26 : vector<16x128xf32>
    %29 = arith.maximumf %26, %28 : vector<16x128xf32>
    %30 = arith.truncf %29 : vector<16x128xf32> to vector<16x128xbf16>
    %cst_21 = arith.constant dense<0.000000e+00> : vector<16x128xf32>
    %31 = tpu.matmul %1, %30, %cst_21 {dimension_numbers = #tpu.dot_dimension_numbers<[1], [0], [0], [1], [0, 0, 1, 1], [], []>} : vector<16x16xbf16>, vector<16x128xbf16>, vector<16x128xf32> -> vector<16x128xf32>
    %32 = arith.truncf %31 : vector<16x128xf32> to vector<16x128xbf16>
    %c0_22 = arith.constant 0 : index
    %c0_23 = arith.constant 0 : index
    %33 = vector.load %arg7[%c0_22, %c0_23] : memref<256x256xbf16, #tpu.memory_space<vmem>>, vector<128x256xbf16>
    %cst_24 = arith.constant dense<0.000000e+00> : vector<16x256xf32>
    %34 = tpu.matmul %32, %33, %cst_24 {dimension_numbers = #tpu.dot_dimension_numbers<[1], [0], [0], [1], [0, 0, 1, 1], [], []>} : vector<16x128xbf16>, vector<128x256xbf16>, vector<16x256xf32> -> vector<16x256xf32>
    %c128_25 = arith.constant 128 : index
    %c0_26 = arith.constant 0 : index
    %35 = vector.load %arg7[%c128_25, %c0_26] : memref<256x256xbf16, #tpu.memory_space<vmem>>, vector<128x256xbf16>
    %cst_27 = arith.constant dense<0.000000e+00> : vector<16x256xf32>
    %36 = tpu.matmul %30, %35, %cst_27 {dimension_numbers = #tpu.dot_dimension_numbers<[1], [0], [0], [1], [0, 0, 1, 1], [], []>} : vector<16x128xbf16>, vector<128x256xbf16>, vector<16x256xf32> -> vector<16x256xf32>
    %37 = arith.addf %34, %36 : vector<16x256xf32>
    %c0_28 = arith.constant 0 : index
    %c0_29 = arith.constant 0 : index
    %38 = vector.load %arg8[%c0_28, %c0_29] : memref<1x256xf32, #tpu.memory_space<vmem>>, vector<1x256xf32>
    %39 = vector.broadcast %38 : vector<1x256xf32> to vector<16x256xf32>
    %40 = arith.addf %37, %39 : vector<16x256xf32>
    %cst_30 = arith.constant 0.00999999977 : f32
    %41 = vector.broadcast %cst_30 : f32 to vector<16x256xf32>
    %42 = arith.mulf %41, %40 : vector<16x256xf32>
    %43 = arith.maximumf %40, %42 : vector<16x256xf32>
    %cst_31 = arith.constant dense<0xFF800000> : vector<256xf32>
    %44 = vector.multi_reduction <maximumf>, %43, %cst_31 [0] : vector<16x256xf32> to vector<256xf32>
    %45 = vector.shape_cast %44 : vector<256xf32> to vector<1x256xf32>
    %c0_32 = arith.constant 0 : index
    %c0_33 = arith.constant 0 : index
    %46 = vector.load %arg9[%c0_32, %c0_33] : memref<256x128xf32, #tpu.memory_space<vmem>>, vector<256x128xf32>
    %cst_34 = arith.constant dense<0.000000e+00> : vector<1x128xf32>
    %47 = tpu.matmul %45, %46, %cst_34 {dimension_numbers = #tpu.dot_dimension_numbers<[1], [0], [0], [1], [0, 0, 1, 1], [], []>} : vector<1x256xf32>, vector<256x128xf32>, vector<1x128xf32> -> vector<1x128xf32>
    %c0_35 = arith.constant 0 : index
    %c0_36 = arith.constant 0 : index
    %48 = vector.load %arg10[%c0_35, %c0_36] : memref<1x128xf32, #tpu.memory_space<vmem>>, vector<1x128xf32>
    %49 = arith.addf %47, %48 : vector<1x128xf32>
    %c0_37 = arith.constant 0 : index
    %c0_38 = arith.constant 0 : index
    %50 = vector.load %arg11[%c0_37, %c0_38] : memref<128x128xf32, #tpu.memory_space<vmem>>, vector<128x128xf32>
    %cst_39 = arith.constant dense<0.000000e+00> : vector<1x128xf32>
    %51 = tpu.matmul %49, %50, %cst_39 {dimension_numbers = #tpu.dot_dimension_numbers<[1], [0], [0], [1], [0, 0, 1, 1], [], []>} : vector<1x128xf32>, vector<128x128xf32>, vector<1x128xf32> -> vector<1x128xf32>
    %c0_40 = arith.constant 0 : index
    %c0_41 = arith.constant 0 : index
    %52 = vector.load %arg12[%c0_40, %c0_41] : memref<1x128xf32, #tpu.memory_space<vmem>>, vector<1x128xf32>
    %53 = arith.addf %51, %52 : vector<1x128xf32>
    %cst_42 = arith.constant 0.00999999977 : f32
    %54 = vector.broadcast %cst_42 : f32 to vector<1x128xf32>
    %55 = arith.mulf %54, %53 : vector<1x128xf32>
    %56 = arith.maximumf %53, %55 : vector<1x128xf32>
    %c0_43 = arith.constant 0 : index
    %c0_44 = arith.constant 0 : index
    %57 = vector.load %arg13[%c0_43, %c0_44] : memref<128x128xf32, #tpu.memory_space<vmem>>, vector<128x128xf32>
    %cst_45 = arith.constant dense<0.000000e+00> : vector<1x128xf32>
    %58 = tpu.matmul %56, %57, %cst_45 {dimension_numbers = #tpu.dot_dimension_numbers<[1], [0], [0], [1], [0, 0, 1, 1], [], []>} : vector<1x128xf32>, vector<128x128xf32>, vector<1x128xf32> -> vector<1x128xf32>
    %c0_46 = arith.constant 0 : index
    %c0_47 = arith.constant 0 : index
    %59 = vector.load %arg14[%c0_46, %c0_47] : memref<1x128xf32, #tpu.memory_space<vmem>>, vector<1x128xf32>
    %60 = arith.addf %58, %59 : vector<1x128xf32>
    %61 = vector.shape_cast %60 : vector<1x128xf32> to vector<1x1x128xf32>
    %c0_48 = arith.constant 0 : index
    %c0_49 = arith.constant 0 : index
    %c0_50 = arith.constant 0 : index
    %62 = vector.load %arg15[%c0_48, %c0_49, %c0_50] : memref<1x1x128xf32, #tpu.memory_space<vmem>>, vector<1x1x128xf32>
    tpu.vector_store %arg15[%c0_48, %c0_49, %c0_50], %61 {strides = array<i32>} : memref<1x1x128xf32, #tpu.memory_space<vmem>>, vector<1x1x128xf32>,
    return
  }
  func.func @transform_0(%arg0: i32) -> (i32, i32) {
    %c0_i32 = arith.constant 0 : i32
    %c0_i32_0 = arith.constant 0 : i32
    return %arg0, %c0_i32 : i32, i32
  }
  func.func @transform_1(%arg0: i32) -> (i32, i32, i32) {
    %c0_i32 = arith.constant 0 : i32
    %c0_i32_0 = arith.constant 0 : i32
    %c0_i32_1 = arith.constant 0 : i32
    return %arg0, %c0_i32, %c0_i32_0 : i32, i32, i32
  }
  func.func @transform_2(%arg0: i32) -> (i32, i32) {
    %c0_i32 = arith.constant 0 : i32
    %c0_i32_0 = arith.constant 0 : i32
    %c0_i32_1 = arith.constant 0 : i32
    return %c0_i32, %c0_i32_0 : i32, i32
  }
  func.func @transform_3(%arg0: i32) -> (i32, i32) {
    %c0_i32 = arith.constant 0 : i32
    %c0_i32_0 = arith.constant 0 : i32
    %c0_i32_1 = arith.constant 0 : i32
    return %c0_i32, %c0_i32_0 : i32, i32
  }
  func.func @transform_4(%arg0: i32) -> (i32, i32) {
    %c0_i32 = arith.constant 0 : i32
    %c0_i32_0 = arith.constant 0 : i32
    %c0_i32_1 = arith.constant 0 : i32
    return %c0_i32, %c0_i32_0 : i32, i32
  }
  func.func @transform_5(%arg0: i32) -> (i32, i32) {
    %c0_i32 = arith.constant 0 : i32
    %c0_i32_0 = arith.constant 0 : i32
    %c0_i32_1 = arith.constant 0 : i32
    return %c0_i32, %c0_i32_0 : i32, i32
  }
  func.func @transform_6(%arg0: i32) -> (i32, i32) {
    %c0_i32 = arith.constant 0 : i32
    %c0_i32_0 = arith.constant 0 : i32
    %c0_i32_1 = arith.constant 0 : i32
    return %c0_i32, %c0_i32_0 : i32, i32
  }
  func.func @transform_7(%arg0: i32) -> (i32, i32) {
    %c0_i32 = arith.constant 0 : i32
    %c0_i32_0 = arith.constant 0 : i32
    %c0_i32_1 = arith.constant 0 : i32
    return %c0_i32, %c0_i32_0 : i32, i32
  }
  func.func @transform_8(%arg0: i32) -> (i32, i32) {
    %c0_i32 = arith.constant 0 : i32
    %c0_i32_0 = arith.constant 0 : i32
    %c0_i32_1 = arith.constant 0 : i32
    return %c0_i32, %c0_i32_0 : i32, i32
  }
  func.func @transform_9(%arg0: i32) -> (i32, i32) {
    %c0_i32 = arith.constant 0 : i32
    %c0_i32_0 = arith.constant 0 : i32
    %c0_i32_1 = arith.constant 0 : i32
    return %c0_i32, %c0_i32_0 : i32, i32
  }
  func.func @transform_10(%arg0: i32) -> (i32, i32) {
    %c0_i32 = arith.constant 0 : i32
    %c0_i32_0 = arith.constant 0 : i32
    %c0_i32_1 = arith.constant 0 : i32
    return %c0_i32, %c0_i32_0 : i32, i32
  }
  func.func @transform_11(%arg0: i32) -> (i32, i32) {
    %c0_i32 = arith.constant 0 : i32
    %c0_i32_0 = arith.constant 0 : i32
    %c0_i32_1 = arith.constant 0 : i32
    return %c0_i32, %c0_i32_0 : i32, i32
  }
  func.func @transform_12(%arg0: i32) -> (i32, i32) {
    %c0_i32 = arith.constant 0 : i32
    %c0_i32_0 = arith.constant 0 : i32
    %c0_i32_1 = arith.constant 0 : i32
    return %c0_i32, %c0_i32_0 : i32, i32
  }
  func.func @transform_13(%arg0: i32) -> (i32, i32) {
    %c0_i32 = arith.constant 0 : i32
    %c0_i32_0 = arith.constant 0 : i32
    %c0_i32_1 = arith.constant 0 : i32
    return %c0_i32, %c0_i32_0 : i32, i32
  }
  func.func @transform_14(%arg0: i32) -> (i32, i32, i32) {
    %c0_i32 = arith.constant 0 : i32
    %c0_i32_0 = arith.constant 0 : i32
    %c0_i32_1 = arith.constant 0 : i32
    return %arg0, %c0_i32, %c0_i32_0 : i32, i32, i32
  }
}

</mosaic_0001>

<bundles_post_ra>
// kernel: tpu_custom_call.1
= control target key start
LH: loop header
LB: loop body
LE: loop exit
PB: predicated region body
PF: predicated region fallthrough
CT: control target
= control target key end

     0   :  { %s3419_s0 = inlined_call_operand.hbm [shape: bf16[32,64], index: 0, kind: input, shape index: {}]   ;;  %s3420_s1 = inlined_call_operand.hbm [shape: bf16[2,16,16], index: 1, kind: input, shape index: {}]   ;;  %s3421_s2 = inlined_call_operand.hbm [shape: bf16[128,128], index: 2, kind: input, shape index: {}]   ;;  %s3422_s3 = inlined_call_operand.vmem [shape: f32[1,128], index: 3, kind: input, shape index: {}]   ;;  %s3423_s4 = inlined_call_operand.hbm [shape: bf16[256,128], index: 4, kind: input, shape index: {}]   ;;  %s3424_s5 = inlined_call_operand.vmem [shape: f32[1,128], index: 5, kind: input, shape index: {}]   ;;  %s3425_s6 = inlined_call_operand.hbm [shape: bf16[256,256], index: 6, kind: input, shape index: {}]   ;;  %s3426_s7 = inlined_call_operand.vmem [shape: f32[1,256], index: 7, kind: input, shape index: {}]   ;;  %s3427_s8 = inlined_call_operand.hbm [shape: f32[256,128], index: 8, kind: input, shape index: {}]   ;;  %s3428_s9 = inlined_call_operand.vmem [shape: f32[1,128], index: 9, kind: input, shape index: {}]   ;;  %s3429_s10 = inlined_call_operand.hbm [shape: f32[128,128], index: 10, kind: input, shape index: {}]   ;;  %s3430_s11 = inlined_call_operand.vmem [shape: f32[1,128], index: 11, kind: input, shape index: {}]   ;;  %s3431_s12 = inlined_call_operand.hbm [shape: f32[128,128], index: 12, kind: input, shape index: {}]   ;;  %s3432_s13 = inlined_call_operand.vmem [shape: f32[1,128], index: 13, kind: input, shape index: {}]   ;;  %s3433_s14 = inlined_call_operand.hbm [shape: f32[2,1,128], index: 14, kind: output, shape index: {}]  }
   0x1   :  { %3442 = sst [smem:[#allocation24_spill]] %s3419_s0 }
   0x2   :  { %3443 = sst [smem:[#allocation25_spill]] %s3421_s2 }
   0x3   :  { %3444 = sst [smem:[#allocation26_spill]] %s3423_s4 }
   0x4   :  { %3445 = sst [smem:[#allocation27_spill]] %s3424_s5 }
   0x5   :  { %3446 = sst [smem:[#allocation28_spill]] %s3425_s6 }
   0x6   :  { %3447 = sst [smem:[#allocation29_spill]] %s3426_s7 }
   0x7   :  { %3448 = sst [smem:[#allocation30_spill]] %s3427_s8 }
   0x8   :  { %3449 = sst [smem:[#allocation31_spill]] %s3428_s9 }
   0x9   :  { %3450 = sst [smem:[#allocation32_spill]] %s3430_s11 }
   0xa   :  { %3451 = sst [smem:[#allocation33_spill]] %s3432_s13 }
   0xb   :  { %3452 = sst [smem:[#allocation34_spill]] %s3433_s14 }
   0xc   :  { %19 = vsyncpa [#allocation3], 0 }
   0xd   :  { %21 = vsyncpa [#allocation3 + $0x1], 0 }
   0xe   :  { %22 = vsyncpa [#allocation6], 0 }
   0xf   :  { %24 = vsyncpa [#allocation6 + $0x1], 0 }
  0x10   :  { %25 = vsyncpa [#allocation9], 0 }
  0x11   :  { %26 = vsyncpa [#allocation12], 0 }
  0x12   :  { %27 = vsyncpa [#allocation15], 0 }
  0x13   :  { %28 = vsyncpa [#allocation4], 0 }
  0x14   :  { %30 = vsyncpa [#allocation4 + $0x1], 0  ;;  %s2940_s29 = smov 0   ;;  %s2942_s30 = smov 0  }
  0x15   :  { %s2944_s15 = smov 0   ;;  %s2946_s16 = smov 0  }
  0x16 LB: > { %s2848_s17 = smov [#allocation7]   ;;  %s2961_s19 = sadd.s32 4294967295, %s2846_s16   ;;  %s2846_s16 = sphi %s2946_s16, %s3490_s16   ;;  %s2842_s15 = sphi %s2944_s15, %s3489_s15   ;;  %s2838_s30 = sphi %s2942_s30, %s3488_s30   ;;  %s2834_s29 = sphi %s2940_s29, %s3487_s29  }
  0x17   : > { %s383_s18 = sshll.u32 %s2848_s17, 4  ;;  %p1906_p0 = scmp.ge.s32.totalorder %s2846_s16, 1  ;;  %s2966_s18 = int_to_ptr.vmem [resolvable:$true] %s383_s18 }
  0x18   : > { %p3435_p1 = scmp.eq.s32.totalorder %s2961_s19, 0  ;;  %p371_p2 = scmp.lt.s32.totalorder %s2846_s16, 3 }
  0x19   : > { %s2849_s21 = smov [#allocation8]   ;;  %s2850_s24 = smov [#allocation11]  }
  0x1a   : > { %p2968_p3 = pnand %p1906_p0, %p371_p2  ;;  %s399_s22 = sshll.u32 %s2849_s21, 4  ;;  %s2981_s22 = int_to_ptr.vmem [resolvable:$true] %s399_s22 }
  0x1b   : > { %s2983_s25 = sshll.u32 %s2850_s24, 4  ;;  %s3455_s2 = sld [smem:[#allocation25_spill]]  ;;  %s432_s25 = int_to_ptr.vmem [resolvable:$true] %s2983_s25 }
  0x1c   : > { %s3453_s20 = scalar_select %p2968_p3, 1, 0 }
  0x1d   : > { %p2368_p5 = pneg %p2968_p3 }
  0x1f   : > { %p2977_p6 = pnand %p2368_p5, %p3435_p1 }
  0x21   : > { %s2532_s28 = scalar_lea.hbm %s3455_s2, 1024  ;;  %p2993_p8 = pneg %p2977_p6 }
  0x22   : > { %p2533_p7 = scmp.ne.s32.totalorder %s3455_s2, %s2532_s28  ;;  %p2539_p11 = scmp.lt.u32.totalorder %s2532_s28, %s3455_s2 }
  0x24   : > { %p2535_p9 = pnand %p2993_p8, %p2533_p7 }
  0x26   : > { %p2536_p10 = pneg %p2535_p9 }
  0x28   : > { %p2541_p12 = pnand %p2539_p11, %p2536_p10 }
  0x2a   : > { %2544 = shalt.err (!%p2541_p12)
}
  0x2b   : > { %s2545_s14 = scalar_lea.vmem %s2966_s18, 1024  ;;  %p2553_p5 = scmp.lt.s32.totalorder %s2966_s18, %s2966_s18 }
  0x2c   : > { %p2546_p13 = scmp.ne.s32.totalorder %s2966_s18, %s2545_s14  ;;  %p2554_p4 = scmp.lt.s32.totalorder %s2545_s14, %s2545_s14 }
  0x2e   : > { %p2548_p0 = pnand %p2546_p13, %p2993_p8  ;;  %p2555_p7 = por %p2554_p4, %p2553_p5 }
  0x30   : > { %p2549_p2 = pneg %p2548_p0 }
  0x32   : > { %p2556_p9 = pnand %p2555_p7, %p2549_p2 }
  0x34   : > { %2559 = shalt.err (!%p2556_p9)
}
  0x35   : > { %s3437_s26 = smov 64   ;;  %s3439_s13 = smov 4  }
  0x36   : > { %2371 = dma.hbm_to_vmem [thread:$0]  (!%p2977_p6), %s3455_s2, 1024, %s2966_s18, [#allocation6], %s3437_s26, %s3437_s26, %s3439_s13  }
  0x37   : > { %s3457_s4 = sld [smem:[#allocation26_spill]] }
  0x3d   : > { %s2560_s14 = scalar_lea.hbm %s3457_s4, 2048 }
  0x3e   : > { %p2561_p4 = scmp.ne.s32.totalorder %s3457_s4, %s2560_s14  ;;  %p2567_p12 = scmp.lt.u32.totalorder %s2560_s14, %s3457_s4 }
  0x40   : > { %p2563_p10 = pnand %p2561_p4, %p2993_p8 }
  0x42   : > { %p2564_p11 = pneg %p2563_p10 }
  0x44   : > { %p2569_p13 = pnand %p2567_p12, %p2564_p11 }
  0x46   : > { %2572 = shalt.err (!%p2569_p13)
}
  0x47   : > { %s2573_s18 = scalar_lea.vmem %s2981_s22, 2048  ;;  %p2581_p7 = scmp.lt.s32.totalorder %s2981_s22, %s2981_s22 }
  0x48   : > { %p2574_p0 = scmp.ne.s32.totalorder %s2981_s22, %s2573_s18  ;;  %p2582_p9 = scmp.lt.s32.totalorder %s2573_s18, %s2573_s18 }
  0x4a   : > { %p2576_p2 = pnand %p2574_p0, %p2993_p8  ;;  %p2583_p4 = por %p2582_p9, %p2581_p7 }
  0x4c   : > { %p2577_p5 = pneg %p2576_p2 }
  0x4e   : > { %p2584_p10 = pnand %p2583_p4, %p2577_p5 }
  0x50   : > { %2587 = shalt.err (!%p2584_p10)
}
  0x51   : > { %2374 = dma.hbm_to_vmem [thread:$0]  (!%p2977_p6), %s3457_s4, 2048, %s2981_s22, [#allocation9], %s3437_s26, %s3437_s26, %s3439_s13  }
  0x52   : > { %s3458_s8 = sld [smem:[#allocation30_spill]] }
  0x58   : > { %s2588_s27 = scalar_lea.hbm %s3458_s8, 4096 }
  0x59   : > { %p2589_p11 = scmp.ne.s32.totalorder %s3458_s8, %s2588_s27  ;;  %p2595_p0 = scmp.lt.u32.totalorder %s2588_s27, %s3458_s8 }
  0x5b   : > { %p2591_p12 = pnand %p2589_p11, %p2993_p8 }
  0x5d   : > { %p2592_p13 = pneg %p2591_p12 }
  0x5f   : > { %p2597_p2 = pnand %p2595_p0, %p2592_p13 }
  0x61   : > { %2600 = shalt.err (!%p2597_p2)
}
  0x62   : > { %s2601_s18 = scalar_lea.vmem %s432_s25, 4096  ;;  %p2609_p4 = scmp.lt.s32.totalorder %s432_s25, %s432_s25 }
  0x63   : > { %p2602_p5 = scmp.ne.s32.totalorder %s432_s25, %s2601_s18  ;;  %p2610_p10 = scmp.lt.s32.totalorder %s2601_s18, %s2601_s18 }
  0x65   : > { %p2604_p7 = pnand %p2602_p5, %p2993_p8  ;;  %p2611_p1 = por %p2610_p10, %p2609_p4 }
  0x67   : > { %p2605_p9 = pneg %p2604_p7 }
  0x69   : > { %p2612_p3 = pnand %p2611_p1, %p2605_p9 }
  0x6b   : > { %2615 = shalt.err (!%p2612_p3)
}
  0x6c   : > { %s2853_s22 = smov 128   ;;  %s2854_s5 = smov 8  }
  0x6d   : > { %2380 = dma.hbm_to_vmem [thread:$0]  (!%p2977_p6), %s3458_s8, 4096, %s432_s25, [#allocation12], %s2853_s22, %s2853_s22, %s2854_s5  }
  0x6e   : > { %s2855_s11 = smov [#allocation10]   ;;  %s2856_s28 = smov [#allocation13]  }
  0x6f   : > { %s415_s27 = sshll.u32 %s2855_s11, 4  ;;  %s447_s17 = sshll.u32 %s2856_s28, 4  ;;  %s416_s27 = int_to_ptr.vmem [resolvable:$true] %s415_s27  ;;  %s448_s17 = int_to_ptr.vmem [resolvable:$true] %s447_s17 }
  0x70   : > { %s3459_s6 = sld [smem:[#allocation28_spill]] }
  0x76   : > { %s2616_s18 = scalar_lea.hbm %s3459_s6, 4096 }
  0x77   : > { %p2617_p1 = scmp.ne.s32.totalorder %s3459_s6, %s2616_s18  ;;  %p2623_p12 = scmp.lt.u32.totalorder %s2616_s18, %s3459_s6 }
  0x79   : > { %p2619_p3 = pnand %p2617_p1, %p2993_p8 }
  0x7b   : > { %p2620_p11 = pneg %p2619_p3 }
  0x7d   : > { %p2625_p13 = pnand %p2623_p12, %p2620_p11 }
  0x7f   : > { %2628 = shalt.err (!%p2625_p13)
}
  0x80   : > { %s2629_s25 = scalar_lea.vmem %s416_s27, 4096  ;;  %p2637_p7 = scmp.lt.s32.totalorder %s416_s27, %s416_s27 }
  0x81   : > { %p2630_p0 = scmp.ne.s32.totalorder %s416_s27, %s2629_s25  ;;  %p2638_p9 = scmp.lt.s32.totalorder %s2629_s25, %s2629_s25 }
  0x83   : > { %p2632_p2 = pnand %p2630_p0, %p2993_p8  ;;  %p2639_p4 = por %p2638_p9, %p2637_p7 }
  0x85   : > { %p2633_p5 = pneg %p2632_p2 }
  0x87   : > { %p2640_p10 = pnand %p2639_p4, %p2633_p5 }
  0x89   : > { %2643 = shalt.err (!%p2640_p10)
}
  0x8a   : > { %2377 = dma.hbm_to_vmem [thread:$0]  (!%p2977_p6), %s3459_s6, 4096, %s416_s27, [#allocation9], %s2853_s22, %s2853_s22, %s2854_s5  }
  0x8b   : > { %s2644_s7 = scalar_lea.hbm %s3429_s10, 2048 }
  0x8c   : > { %p2645_p1 = scmp.ne.s32.totalorder %s3429_s10, %s2644_s7  ;;  %p2651_p12 = scmp.lt.u32.totalorder %s2644_s7, %s3429_s10 }
  0x8e   : > { %p2647_p3 = pnand %p2645_p1, %p2993_p8 }
  0x90   : > { %p2648_p11 = pneg %p2647_p3 }
  0x92   : > { %p2653_p13 = pnand %p2651_p12, %p2648_p11 }
  0x94   : > { %2656 = shalt.err (!%p2653_p13)
}
  0x95   : > { %s2657_s14 = scalar_lea.vmem %s448_s17, 2048  ;;  %p2665_p7 = scmp.lt.s32.totalorder %s448_s17, %s448_s17 }
  0x96   : > { %p2658_p0 = scmp.ne.s32.totalorder %s448_s17, %s2657_s14  ;;  %p2666_p9 = scmp.lt.s32.totalorder %s2657_s14, %s2657_s14 }
  0x98   : > { %p2660_p2 = pnand %p2658_p0, %p2993_p8  ;;  %p2667_p4 = por %p2666_p9, %p2665_p7 }
  0x9a   : > { %p2661_p5 = pneg %p2660_p2 }
  0x9c   : > { %p2668_p10 = pnand %p2667_p4, %p2661_p5 }
  0x9e   : > { %2671 = shalt.err (!%p2668_p10)
}
  0x9f   : > { %2383 = dma.hbm_to_vmem [thread:$0]  (!%p2977_p6), %s3429_s10, 2048, %s448_s17, [#allocation12], %s2853_s22, %s2853_s22, %s2854_s5  }
  0xa0   : > { %s2857_s25 = smov [#allocation14]   ;;  %s2672_s13 = scalar_lea.hbm %s3431_s12, 2048 }
  0xa1   : > { %s463_s2 = sshll.u32 %s2857_s25, 4  ;;  %p2673_p1 = scmp.ne.s32.totalorder %s3431_s12, %s2672_s13  ;;  %s464_s2 = int_to_ptr.vmem [resolvable:$true] %s463_s2 }
  0xa2   : > { %p2679_p12 = scmp.lt.u32.totalorder %s2672_s13, %s3431_s12 }
  0xa3   : > { %p2675_p3 = pnand %p2673_p1, %p2993_p8 }
  0xa5   : > { %p2676_p11 = pneg %p2675_p3 }
  0xa7   : > { %p2681_p13 = pnand %p2679_p12, %p2676_p11 }
  0xa9   : > { %2684 = shalt.err (!%p2681_p13)
}
  0xaa   : > { %s2685_s17 = scalar_lea.vmem %s464_s2, 2048  ;;  %p2693_p7 = scmp.lt.s32.totalorder %s464_s2, %s464_s2 }
  0xab   : > { %p2686_p0 = scmp.ne.s32.totalorder %s464_s2, %s2685_s17  ;;  %p2694_p9 = scmp.lt.s32.totalorder %s2685_s17, %s2685_s17 }
  0xad   : > { %p2688_p2 = pnand %p2686_p0, %p2993_p8  ;;  %p2695_p4 = por %p2694_p9, %p2693_p7 }
  0xaf   : > { %p2689_p5 = pneg %p2688_p2 }
  0xb1   : > { %p2696_p10 = pnand %p2695_p4, %p2689_p5 }
  0xb3   : > { %2699 = shalt.err (!%p2696_p10)
}
  0xb4   : > { %2386 = dma.hbm_to_vmem [thread:$0]  (!%p2977_p6), %s3431_s12, 2048, %s464_s2, [#allocation15], %s2853_s22, %s2853_s22, %s2854_s5  }
  0xb5   : > { %s1905_s23 = sadd.s32 4294967294, %s2846_s16   ;;  %s3130_s21 = sadd.s32 1, %s2846_s16  }
  0xb6   : > { %s40_s27 = ssub.s32 %s2846_s16, %s3130_s21  ;;  %s43_s18 = sadd.s32 1, %s2842_s15 }
  0xb7   : > { %p41_p8 = scmp.eq.s32.totalorder %s40_s27, 0  ;;  %p50_p1 = scmp.ne.s32.totalorder %s2842_s15, %s2838_s30 }
  0xb8   : > { %p51_p3 = scmp.eq.s32.totalorder %s2846_s16, 0  ;;  %p56_p11 = scmp.ne.s32.totalorder %s2838_s30, %s2834_s29 }
  0xb9   : > { %s3141_s25 = scalar_select %p41_p8, %s2842_s15, %s43_s18  }
  0xba   : > { %p3143_p12 = por %p51_p3, %p50_p1  ;;  %p3461_p13 = scmp.eq.s32.totalorder %s2961_s19, 0 }
  0xbb   : > { %p358_p0 = scmp.eq.s32.totalorder %s2961_s19, 1  ;;  %p364_p2 = scmp.eq.s32.totalorder %s1905_s23, 1 }
  0xbc   : > { %p3149_p6 = por %p3461_p13, %p56_p11  ;;  %p2404_p5 = scmp.lt.s32.totalorder %s2846_s16, 2 }
  0xbd   : > { %s480_s5 = sand.u32 1, %s2842_s15   ;;  %p3156_p7 = por %p358_p0, %p50_p1 }
  0xbe   : > { %p3160_p9 = por %p364_p2, %p56_p11  ;;  %s1914_s13 = sshll.u32 %s480_s5, 3 }
  0xbf   : > { %s3463_s2 = scalar_select %p3156_p7, 1, 0 }
  0xc0   : > { %s3464_s26 = scalar_select %p3160_p9, 1, 0 }
  0xc1   : > { %s1997_s7 = sshll.u32 %s2846_s16, 7  ;;  %s3465_s0 = sld [smem:[#allocation24_spill]] }
  0xc2   : > { %s484_s17 = scalar_lea.vmem [#allocation2], %s1914_s13  ;;  %p3174_p4 = pnand %p2404_p5, %p3143_p12 }
  0xc3   : > { %s491_s24 = sshll.u32 %s484_s17, 4  ;;  %s3181_s18 = scalar_lea.hbm %s3420_s1, %s1997_s7  ;;  %s3170_s24 = int_to_ptr.vmem [resolvable:$true] %s491_s24 }
  0xc4   : > { %s505_s9 = scalar_lea.vmem [#allocation5], %s1914_s13  ;;  %s3185_s6 = scalar_lea.sflag [#allocation3], %s480_s5 }
  0xc5   : > { %s3183_s11 = sshll.u32 %s505_s9, 4  ;;  %p2702_p8 = pneg %p3174_p4  ;;  %s3217_s11 = int_to_ptr.vmem [resolvable:$true] %s3183_s11 }
  0xc7   : > { %s3168_s28 = scalar_lea.hbm %s3465_s0, %s1997_s7  ;;  %s2705_s23 = scalar_lea.hbm %s3465_s0, 256 }
  0xc8   : > { %s2700_s17 = scalar_lea.hbm %s3168_s28, 128  ;;  %p2706_p11 = scmp.lt.u32.totalorder %s3168_s28, %s3465_s0 }
  0xc9   : > { %p2701_p10 = scmp.ne.s32.totalorder %s3168_s28, %s2700_s17  ;;  %p2707_p12 = scmp.lt.u32.totalorder %s2705_s23, %s2700_s17 }
  0xca   : > { %p2709_p0 = scmp.lt.u32.totalorder %s2700_s17, %s3168_s28 }
  0xcb   : > { %p2703_p1 = pnand %p2702_p8, %p2701_p10  ;;  %p2708_p13 = por %p2707_p12, %p2706_p11 }
  0xcd   : > { %p2704_p3 = pneg %p2703_p1  ;;  %p2710_p2 = por %p2709_p0, %p2708_p13 }
  0xcf   : > { %p2711_p5 = pnand %p2710_p2, %p2704_p3 }
  0xd1   : > { %2714 = shalt.err (!%p2711_p5)
}
  0xd2   : > { %s2715_s5 = scalar_lea.vmem %s3170_s24, 128  ;;  %s2858_s8 = smov [#allocation2]  }
  0xd3   : > { %p2716_p10 = scmp.ne.s32.totalorder %s3170_s24, %s2715_s5  ;;  %s2720_s13 = sshll.u32 %s2858_s8, 4  ;;  %s2721_s13 = int_to_ptr.vmem [resolvable:$false] %s2720_s13 }
  0xd4   : > { %s2722_s9 = scalar_lea.vmem %s2721_s13, 256  ;;  %p2723_p7 = scmp.lt.s32.totalorder %s3170_s24, %s2721_s13 }
  0xd5   : > { %p2718_p1 = pnand %p2716_p10, %p2702_p8  ;;  %p2724_p11 = scmp.lt.s32.totalorder %s2722_s9, %s2715_s5 }
  0xd7   : > { %p2719_p9 = pneg %p2718_p1  ;;  %p2725_p12 = por %p2724_p11, %p2723_p7 }
  0xd9   : > { %p2726_p13 = pnand %p2725_p12, %p2719_p9 }
  0xdb   : > { %2729 = shalt.err (!%p2726_p13)
}
  0xdc   : > { %s3467_s17 = smov 4   ;;  %s3468_s4 = smov 64  }
  0xdd   : > { %2390 = dma.hbm_to_vmem [thread:$0]  (!%p3174_p4), %s3168_s28, 128, %s3170_s24, %s3185_s6, %s3468_s4, %s3468_s4, %s3467_s17  }
  0xde   : > { %s501_s23 = sand.u32 1, %s2846_s16   ;;  %s2730_s7 = scalar_lea.hbm %s3181_s18, 128 }
  0xdf   : > { %s3220_s27 = scalar_lea.sflag [#allocation6], %s501_s23  ;;  %p2731_p7 = scmp.ne.s32.totalorder %s3181_s18, %s2730_s7 }
  0xe0   : > { %s2735_s13 = scalar_lea.hbm %s3420_s1, 256  ;;  %p2736_p0 = scmp.lt.u32.totalorder %s3181_s18, %s3420_s1 }
  0xe1   : > { %p2733_p9 = pnand %p2731_p7, %p2702_p8  ;;  %p2737_p2 = scmp.lt.u32.totalorder %s2735_s13, %s2730_s7 }
  0xe2   : > { %p2739_p10 = scmp.lt.u32.totalorder %s2730_s7, %s3181_s18 }
  0xe3   : > { %p2734_p3 = pneg %p2733_p9  ;;  %p2738_p5 = por %p2737_p2, %p2736_p0 }
  0xe5   : > { %p2740_p1 = por %p2739_p10, %p2738_p5 }
  0xe7   : > { %p2741_p11 = pnand %p2740_p1, %p2734_p3 }
  0xe9   : > { %2744 = shalt.err (!%p2741_p11)
}
  0xea   : > { %s2745_s6 = scalar_lea.vmem %s3217_s11, 128  ;;  %s2859_s28 = smov [#allocation5]  }
  0xeb   : > { %p2746_p12 = scmp.ne.s32.totalorder %s3217_s11, %s2745_s6  ;;  %s2750_s24 = sshll.u32 %s2859_s28, 4  ;;  %s2751_s24 = int_to_ptr.vmem [resolvable:$false] %s2750_s24 }
  0xec   : > { %s2752_s0 = scalar_lea.vmem %s2751_s24, 256  ;;  %p2753_p9 = scmp.lt.s32.totalorder %s3217_s11, %s2751_s24 }
  0xed   : > { %p2748_p13 = pnand %p2746_p12, %p2702_p8  ;;  %p2754_p0 = scmp.lt.s32.totalorder %s2752_s0, %s2745_s6 }
  0xef   : > { %p2749_p7 = pneg %p2748_p13  ;;  %p2755_p2 = por %p2754_p0, %p2753_p9 }
  0xf1   : > { %p2756_p5 = pnand %p2755_p2, %p2749_p7 }
  0xf3   : > { %2759 = shalt.err (!%p2756_p5)
}
  0xf4   : > { %2393 = dma.hbm_to_vmem [thread:$0]  (!%p3174_p4), %s3181_s18, 128, %s3217_s11, %s3220_s27, %s3468_s4, %s3468_s4, %s3467_s17  }
  0xf5   : > { %p3469_p8 = scmp.ne.s32.totalorder %s3453_s20, 0 }
  0xf6   : > { %s3252_s23 = sand.u32 (!%p3469_p8), 1, %s2838_s30  }
  0xf7   : > { %524 = sbr.rel (%p3469_p8) target bundleno = 2278 (0x8e6), region = 76  ;;  %s1921_s7 = sshll.u32 (!%p3469_p8), %s3252_s23, 3 }
  0xf8   : > { %s527_s5 = scalar_lea.sflag (!%p3469_p8), [#allocation3], %s3252_s23  ;;  %s530_s8 = scalar_lea.vmem (!%p3469_p8), [#allocation2], %s1921_s7 }
  0xfe   : > { %2805 = dma.done.wait (%p3149_p6), %s527_s5, 128  }
  0xff   : > { %2807 = vsyncadd (%p3149_p6), %s527_s5, 4294967168  ;;  %s535_s14 = sand.u32 1, %s2961_s19   ;;  %s539_s20 = scalar_lea.vmem [#allocation5], %s1921_s7 }
 0x100   : > { %s536_s18 = scalar_lea.sflag [#allocation6], %s535_s14 }
 0x101   : > { %2809 = dma.done.wait (%p3149_p6), %s536_s18, 128  }
 0x102   : > { %2811 = vsyncadd (%p3149_p6), %s536_s18, 4294967168  ;;  %p3470_p4 = scmp.eq.s32.totalorder %s2961_s19, 0 }
 0x104   : > { %2813 = dma.done.wait (%p3470_p4), [#allocation6], 1024   ;;  %p3471_p3 = pmov %p3470_p4 }
 0x106   : > { %2815 = vsyncadd (%p3471_p3), [#allocation6], 4294966272  ;;  %p3472_p10 = pmov %p3471_p3 }
 0x107   : > { %p3473_p1 = pmov %p3471_p3 }
 0x108   : > { %2817 = dma.done.wait (%p3472_p10), [#allocation9], 6144  }
 0x109   : > { %2819 = vsyncadd (%p3473_p1), [#allocation9], 4294961152  ;;  %p3474_p11 = pmov %p3473_p1 }
 0x10a   : > { %p3475_p12 = pmov %p3473_p1 }
 0x10b   : > { %2821 = dma.done.wait (%p3474_p11), [#allocation12], 6144  }
 0x10c   : > { %2823 = vsyncadd (%p3475_p12), [#allocation12], 4294961152  ;;  %p3476_p6 = pmov %p3473_p1 }
 0x10d   : > { %p3477_p13 = pmov %p3473_p1 }
 0x10e   : > { %2825 = dma.done.wait (%p3476_p6), [#allocation15], 2048  }
 0x10f   : > { %2827 = vsyncadd (%p3477_p13), [#allocation15], 4294965248  ;;  %v2860_v0 = vmov 0.0   ;;  %vm2861_vm0 = vmmov 0   ;;  %v2458_v1 = vld [vmem:[%s530_s8] sm:$0xff]   ;;  %v3287_v2 = vld [vmem:[%s539_s20] sm:$0xff]  }
 0x110   : > { %2102 = vmatprep.subr.bf16.mxu0 %v2860_v0  ;;  %2104 = vmatprep.mubr.msk.bf16.mxu0 %vm2861_vm0, %v2860_v0  ;;  %vm629_vm1 = vcmask 130048   ;;  %v2460_v3 = vld [vmem:[#allocation7 + $0x20] sm:$0xff]   ;;  %v2461_v4 = vld [vmem:[#allocation7 + $0x28] sm:$0xff]   ;;  %v2462_v5 = vld [vmem:[#allocation7 + $0x30] sm:$0xff]   ;;  %vm715_vm2 = vcmask 523264   ;;  %s3478_s27 = sld [smem:[#allocation27_spill]] }
 0x111   : > { %2132 = vmatprep.subr.bf16.mxu1 %v2860_v0  ;;  %2134 = vmatprep.mubr.msk.bf16.mxu1 %vm2861_vm0, %v2860_v0  ;;  %v2463_v6 = vld [vmem:[#allocation7 + $0x38] sm:$0xff]   ;;  %v2464_v7 = vld [vmem:[#allocation7] sm:$0xff]   ;;  %v2465_v8 = vld [vmem:[#allocation7 + $0x8] sm:$0xff]   ;;  %s3479_s6 = sld [smem:[#allocation29_spill]]  ;;  %s3480_s0 = sld [smem:[#allocation31_spill]] }
 0x112   : > { %2103 = vmatpush3.bf16.msra.mxu0 %v2458_v1  ;;  %v2466_v9 = vld [vmem:[#allocation7 + $0x10] sm:$0xff]   ;;  %v2467_v10 = vld [vmem:[#allocation7 + $0x18] sm:$0xff]   ;;  %v2468_v14 = vld [vmem:[#allocation8 + $0x40] sm:$0xff]   ;;  %s3481_s8 = sld [smem:[#allocation32_spill]]  ;;  %s3482_s20 = sld [smem:[#allocation33_spill]] }
 0x113   : > { %2108 = vmatprep.subr.bf16.mxu0 %v2860_v0  ;;  %v2469_v17 = vld [vmem:[#allocation8 + $0x48] sm:$0xff]   ;;  %v2470_v18 = vld [vmem:[#allocation8 + $0x50] sm:$0xff]   ;;  %v2471_v19 = vld [vmem:[#allocation8 + $0x58] sm:$0xff]   ;;  %s1994_s22 = sshll.u32 %s2961_s19, 4  ;;  %s611_s11 = scalar_lea.vmem [#allocation16], %s3252_s23 }
 0x114   : > { %v2472_v23 = vld [vmem:[#allocation8 + $0x60] sm:$0xff]   ;;  %v2473_v25 = vld [vmem:[#allocation8 + $0x68] sm:$0xff]   ;;  %v2474_v26 = vld [vmem:[#allocation8 + $0x70] sm:$0xff]   ;;  %s1759_s17 = sshll.u32 %s611_s11, 4  ;;  %s3483_s13 = sld [smem:[#allocation34_spill]]  ;;  %s3377_s17 = int_to_ptr.vmem [resolvable:$true] %s1759_s17 }
 0x115   : > { %2105 = vmatmul.mubr.msk.bf16.vlgmr.msra.gmra.mrb[0].mxu0 %vm629_vm1, %v3287_v2  ;;  %v2475_v27 = vld [vmem:[#allocation8 + $0x78] sm:$0xff]   ;;  %v1942_v29 = vld [vmem:[%s3422_s3] ss:$0 sm:$0xff]  ;;  %v2477_v43 = vld [vmem:[#allocation8 + $0x8] sm:$0xff]   ;;  %s2760_s28 = scalar_lea.vmem %s3377_s17, 16  ;;  %p3484_p9 = scmp.ne.s32.totalorder %s3463_s2, 0 }
 0x116   : > { %2109 = vmatpush3.bf16.msra.mxu0 %v2460_v3  ;;  %2116 = vmatprep.mubr.msk.bf16.mxu0 %vm2861_vm0, %v2860_v0  ;;  %v2476_v42 = vld [vmem:[#allocation8] sm:$0xff]   ;;  %v2478_v44 = vld [vmem:[#allocation8 + $0x10] sm:$0xff]   ;;  %v2479_v45 = vld [vmem:[#allocation8 + $0x18] sm:$0xff]   ;;  %p2761_p7 = scmp.ne.s32.totalorder %s3377_s17, %s2760_s28  ;;  %s2864_s19 = smov [#allocation16]  }
 0x117   : > { %2110 = vmatprep.subr.bf16.mxu0 %v2860_v0  ;;  %v2480_v46 = vld [vmem:[#allocation8 + $0x20] sm:$0xff]   ;;  %v2481_v47 = vld [vmem:[#allocation8 + $0x28] sm:$0xff]   ;;  %v2482_v48 = vld [vmem:[#allocation8 + $0x30] sm:$0xff]   ;;  %s2764_s24 = sshll.u32 %s2864_s19, 4  ;;  %s2765_s24 = int_to_ptr.vmem [resolvable:$false] %s2764_s24 }
 0x118   : > { %v2483_v49 = vld [vmem:[#allocation8 + $0x38] sm:$0xff]   ;;  %v2486_v50 = vld [vmem:[#allocation10 + $0x84] ss:$8 sps:$4 sm:$0xff]   ;;  %v2484_v58 = vld [vmem:[#allocation10 + $0x80] ss:$8 sps:$4 sm:$0xff]   ;;  %p2762_p0 = pnand %p2761_p7, %p3484_p9  ;;  %p2767_p5 = scmp.lt.s32.totalorder %s3377_s17, %s2765_s24 }
 0x119   : > { %v2489_v61 = vld [vmem:[#allocation10 + $0x94] ss:$8 sps:$4 sm:$0xff]   ;;  %v2487_v62 = vld [vmem:[#allocation10 + $0x90] ss:$8 sps:$4 sm:$0xff]   ;;  %v2492_v63 = vld [vmem:[#allocation10 + $0xa4] ss:$8 sps:$4 sm:$0xff]  }
 0x11a   : > { %2111 = vmatpush3.bf16.msra.mxu0 %v2461_v4  ;;  %v2495_v3 = vld [vmem:[#allocation10 + $0xb4] ss:$8 sps:$4 sm:$0xff]   ;;  %v2493_v4 = vld [vmem:[#allocation10 + $0xb0] ss:$8 sps:$4 sm:$0xff]   ;;  %s3375_s9 = scalar_lea.hbm %s3483_s13, %s1994_s22  ;;  %p2763_p2 = pneg %p2762_p0 }
 0x11b   : > { %2112 = vmatprep.subr.bf16.mxu0 %v2860_v0 }
 0x11e   : > { %2113 = vmatpush3.bf16.msra.mxu0 %v2462_v5  ;;  %v2498_v5 = vld [vmem:[#allocation10 + $0xc4] ss:$8 sps:$4 sm:$0xff]  }
 0x11f   : > { %2114 = vmatprep.subr.bf16.mxu0 %v2860_v0 }
 0x122   : > { %2115 = vmatpush3.bf16.msra.mxu0 %v2463_v6  ;;  %v2496_v6 = vld [vmem:[#allocation10 + $0xc0] ss:$8 sps:$4 sm:$0xff]  }
 0x123   : > { %2120 = vmatprep.subr.bf16.mxu0 %v2860_v0 }
 0x125   : > { %2117 = vmatmul.mubr.msk.bf16.vlgmr.msra.gmra.mrb[4].mxu0 %vm715_vm2, %v2458_v1  ;;  %v2490_v1 = vld [vmem:[#allocation10 + $0xa0] ss:$8 sps:$4 sm:$0xff]  }
 0x126   : > { %2121 = vmatpush3.bf16.msra.mxu0 %v2464_v7  ;;  %2128 = vmatprep.mubr.msk.bf16.mxu0 %vm2861_vm0, %v2860_v0  ;;  %v2501_v7 = vld [vmem:[#allocation10 + $0xd4] ss:$8 sps:$4 sm:$0xff]  }
 0x127   : > { %2122 = vmatprep.subr.bf16.mxu0 %v2860_v0 }
 0x12a   : > { %2123 = vmatpush3.bf16.msra.mxu0 %v2465_v8  ;;  %v2499_v8 = vld [vmem:[#allocation10 + $0xd0] ss:$8 sps:$4 sm:$0xff]  }
 0x12b   : > { %2124 = vmatprep.subr.bf16.mxu0 %v2860_v0 }
 0x12e   : > { %2125 = vmatpush3.bf16.msra.mxu0 %v2466_v9  ;;  %v2504_v9 = vld [vmem:[#allocation10 + $0xe4] ss:$8 sps:$4 sm:$0xff]  }
 0x12f   : > { %2126 = vmatprep.subr.bf16.mxu0 %v2860_v0 }
 0x132   : > { %2127 = vmatpush3.bf16.msra.mxu0 %v2467_v10  ;;  %v2502_v10 = vld [vmem:[#allocation10 + $0xe0] ss:$8 sps:$4 sm:$0xff]  }
 0x133   : > { %2138 = vmatprep.subr.bf16.mxu0 %v2860_v0 }
 0x1e8   : > { %v667_v11 = vpop.f32.mrb[0].mxu0 }
 0x1e9   : > { %v2106_v12 = vpop.f32.mrb[1].mxu0 }
 0x1ea   : > { %v670_v13 = vpop.f32.mrb[2].mxu0  ;;  %v2505_v12 = vld [vmem:[#allocation10 + $0xf0] ss:$8 sps:$4 sm:$0xff]  }
 0x1eb   : > { %v674_v15 = vpack.c.bf16 %v670_v13, %v667_v11  ;;  %v2107_v16 = vpop.f32.mrb[3].mxu0  ;;  %v2507_v11 = vld [vmem:[#allocation10 + $0xf4] ss:$8 sps:$4 sm:$0xff]   ;;  %v2862_v13 = vmov 0  }
 0x1ec   : > { %v1960_v16 = vld [vmem:[%s3478_s27] ss:$0 sm:$0xff] }
 0x1ed   : > { %2129 = vmatmul.mubr.msk.bf16.vlgmr.msra.gmra.mrb[8].mxu0 %vm715_vm2, %v674_v15 }
 0x1ee   : > { %2139 = vmatpush3.bf16.msra.mxu0 %v2468_v14  ;;  %2154 = vmatprep.mubr.msk.bf16.mxu0 %vm2861_vm0, %v2860_v0  ;;  %v2510_v14 = vld [vmem:[#allocation10 + $0x4] ss:$8 sps:$4 sm:$0xff]  }
 0x1ef   : > { %2140 = vmatprep.subr.bf16.mxu0 %v2860_v0 }
 0x1f2   : > { %2141 = vmatpush3.bf16.msra.mxu0 %v2469_v17 }
 0x1f3   : > { %2142 = vmatprep.subr.bf16.mxu0 %v2860_v0 }
 0x1f6   : > { %2143 = vmatpush3.bf16.msra.mxu0 %v2470_v18 }
 0x1f7   : > { %2144 = vmatprep.subr.bf16.mxu0 %v2860_v0 }
 0x1f8   : > { %v753_v20 = vpop.f32.mrb[4].mxu0 }
 0x1f9   : > { %v2118_v21 = vpop.f32.mrb[5].mxu0 }
 0x1fa   : > { %v756_v22 = vpop.f32.mrb[6].mxu0  ;;  %2145 = vmatpush3.bf16.msra.mxu0 %v2471_v19 }
 0x1fb   : > { %v2119_v24 = vpop.f32.mrb[7].mxu0  ;;  %2146 = vmatprep.subr.bf16.mxu0 %v2860_v0 }
 0x1fe   : > { %2147 = vmatpush3.bf16.msra.mxu0 %v2472_v23 }
 0x1ff   : > { %2148 = vmatprep.subr.bf16.mxu0 %v2860_v0 }
 0x202   : > { %2149 = vmatpush3.bf16.msra.mxu0 %v2473_v25 }
 0x203   : > { %2150 = vmatprep.subr.bf16.mxu0 %v2860_v0 }
 0x206   : > { %2151 = vmatpush3.bf16.msra.mxu0 %v2474_v26 }
 0x207   : > { %2152 = vmatprep.subr.bf16.mxu0 %v2860_v0 }
 0x20a   : > { %2153 = vmatpush3.bf16.msra.mxu0 %v2475_v27 }
 0x20b   : > { %2178 = vmatprep.subr.bf16.mxu0 %v2860_v0 }
 0x2c0   : > { %v821_v28 = vpop.f32.mrb[8].mxu0 }
 0x2c1   : > { %v822_v30 = vadd.f32 %v821_v28, %v753_v20  ;;  %v2130_v31 = vpop.f32.mrb[9].mxu0  ;;  %v2508_v28 = vld [vmem:[#allocation10] ss:$8 sps:$4 sm:$0xff]  }
 0x2c2   : > { %v824_v32 = vpop.f32.mrb[10].mxu0  ;;  %v2511_v31 = vld [vmem:[#allocation10 + $0x10] ss:$8 sps:$4 sm:$0xff]  }
 0x2c3   : > { %v835_v33 = vadd.f32 %v1942_v29, %v822_v30  ;;  %v825_v34 = vadd.f32 %v824_v32, %v756_v22  ;;  %v2131_v35 = vpop.f32.mrb[11].mxu0  ;;  %v2513_v30 = vld [vmem:[#allocation10 + $0x14] ss:$8 sps:$4 sm:$0xff]   ;;  %v2516_v32 = vld [vmem:[#allocation10 + $0x24] ss:$8 sps:$4 sm:$0xff]  }
 0x2c4   : > { %v2517_v35 = vld [vmem:[#allocation10 + $0x30] ss:$8 sps:$4 sm:$0xff]  }
 0x2c5   : > { %v837_v36 = vmul.f32 0.01, %v835_v33  ;;  %v836_v37 = vadd.f32 %v1942_v29, %v825_v34  ;;  %v2519_v34 = vld [vmem:[#allocation10 + $0x34] ss:$8 sps:$4 sm:$0xff]  }
 0x2c7   : > { %v838_v38 = vmul.f32 0.01, %v836_v37  ;;  %v839_v39 = vmax.f32 %v835_v33, %v837_v36  ;;  %v2514_v33 = vld [vmem:[#allocation10 + $0x20] ss:$8 sps:$4 sm:$0xff]   ;;  %v2522_v36 = vld [vmem:[#allocation10 + $0x44] ss:$8 sps:$4 sm:$0xff]  }
 0x2c9   : > { %v840_v40 = vmax.f32 %v836_v37, %v838_v38  ;;  %v2520_v37 = vld [vmem:[#allocation10 + $0x40] ss:$8 sps:$4 sm:$0xff]   ;;  %v2525_v38 = vld [vmem:[#allocation10 + $0x54] ss:$8 sps:$4 sm:$0xff]  }
 0x2cb   : > { %v841_v41 = vpack.c.bf16 %v840_v40, %v839_v39  ;;  %v2523_v39 = vld [vmem:[#allocation10 + $0x50] ss:$8 sps:$4 sm:$0xff]   ;;  %v2528_v40 = vld [vmem:[#allocation10 + $0x64] ss:$8 sps:$4 sm:$0xff]  }
 0x2cd   : > { %2133 = vmatpush3.bf16.msra.mxu1 %v841_v41  ;;  %2155 = vmatmul.mubr.bf16.vlgmr.msra.gmra.mrb[12].mxu0 %v841_v41  ;;  %v2526_v41 = vld [vmem:[#allocation10 + $0x60] ss:$8 sps:$4 sm:$0xff]  }
 0x2ce   : > { %2158 = vmatprep.subr.bf16.mxu1 %v2860_v0  ;;  %2180 = vmatprep.mubr.msk.bf16.mxu0 %vm2861_vm0, %v2860_v0 }
 0x2d0   : > { %2135 = vmatmul.mubr.msk.bf16.vlgmr.msra.gmra.mrb[0].mxu1 %vm629_vm1, %v3287_v2 }
 0x2d1   : > { %2159 = vmatpush3.bf16.msra.mxu1 %v2476_v42  ;;  %2174 = vmatprep.mubr.msk.bf16.mxu1 %vm2861_vm0, %v2860_v0  ;;  %v2529_v42 = vld [vmem:[#allocation10 + $0x70] ss:$8 sps:$4 sm:$0xff]  }
 0x2d2   : > { %2160 = vmatprep.subr.bf16.mxu1 %v2860_v0 }
 0x2d5   : > { %2161 = vmatpush3.bf16.msra.mxu1 %v2477_v43  ;;  %v1482_v43 = vld [vmem:[#allocation11 + $0x80] sm:$0xff] }
 0x2d6   : > { %2162 = vmatprep.subr.bf16.mxu1 %v2860_v0 }
 0x2d9   : > { %2163 = vmatpush3.bf16.msra.mxu1 %v2478_v44  ;;  %v1483_v44 = vld [vmem:[#allocation11 + $0x88] sm:$0xff] }
 0x2da   : > { %2164 = vmatprep.subr.bf16.mxu1 %v2860_v0 }
 0x2dd   : > { %2165 = vmatpush3.bf16.msra.mxu1 %v2479_v45  ;;  %v1466_v45 = vld [vmem:[#allocation11] sm:$0xff] }
 0x2de   : > { %2166 = vmatprep.subr.bf16.mxu1 %v2860_v0 }
 0x2e1   : > { %2167 = vmatpush3.bf16.msra.mxu1 %v2480_v46  ;;  %v2254_v46 = vpack.c.bf16 %v1483_v44, %v1482_v43 }
 0x2e2   : > { %2168 = vmatprep.subr.bf16.mxu1 %v2860_v0 }
 0x2e5   : > { %2169 = vmatpush3.bf16.msra.mxu1 %v2481_v47  ;;  %v1467_v47 = vld [vmem:[#allocation11 + $0x8] sm:$0xff] }
 0x2e6   : > { %2170 = vmatprep.subr.bf16.mxu1 %v2860_v0 }
 0x2e9   : > { %2171 = vmatpush3.bf16.msra.mxu1 %v2482_v48  ;;  %v1484_v48 = vld [vmem:[#allocation11 + $0x90] sm:$0xff] }
 0x2ea   : > { %2172 = vmatprep.subr.bf16.mxu1 %v2860_v0 }
 0x2ed   : > { %2173 = vmatpush3.bf16.msra.mxu1 %v2483_v49  ;;  %v1485_v49 = vld [vmem:[#allocation11 + $0x98] sm:$0xff] }
 0x2ee   : > { %1262 = vmatprep.subr.bf16.mxu1 %v2486_v50  ;;  %v2256_v50 = vpack.c.bf16 %v1467_v47, %v1466_v45 }
 0x3a0   : > { %v998_v51 = vpop.f32.mrb[12].mxu0 }
 0x3a1   : > { %v2156_v52 = vpop.f32.mrb[13].mxu0 }
 0x3a2   : > { %v1001_v53 = vpop.f32.mrb[14].mxu0  ;;  %v1468_v52 = vld [vmem:[#allocation11 + $0x10] sm:$0xff] }
 0x3a3   : > { %v876_v54 = vpop.f32.mrb[0].mxu1  ;;  %v2157_v55 = vpop.f32.mrb[15].mxu0 }
 0x3a4   : > { %v2136_v56 = vpop.f32.mrb[1].mxu1 }
 0x3a5   : > { %v879_v57 = vpop.f32.mrb[2].mxu1 }
 0x3a6   : > { %v883_v59 = vpack.c.bf16 %v879_v57, %v876_v54  ;;  %v2137_v60 = vpop.f32.mrb[3].mxu1 }
 0x3a7   : > { %v1486_v60 = vld [vmem:[#allocation11 + $0xa0] sm:$0xff] }
 0x3a8   : > { %2175 = vmatmul.mubr.bf16.vlgmr.msra.gmra.mrb[4].mxu1 %v883_v59 }
 0x3a9   : > { %1263 = vmatpush1.bf16.msra.mxu1 %v2484_v58  ;;  %1294 = vmatprep.mubr.bf16.mxu1 %v2862_v13 }
 0x3aa   : > { %1264 = vmatprep.subr.bf16.mxu1 %v2489_v61  ;;  %v1487_v61 = vld [vmem:[#allocation11 + $0xa8] sm:$0xff] }
 0x3ad   : > { %1265 = vmatpush1.bf16.msra.mxu1 %v2487_v62  ;;  %v2262_v62 = vpack.c.bf16 %v1487_v61, %v1486_v60 }
 0x3ae   : > { %1266 = vmatprep.subr.bf16.mxu1 %v2492_v63  ;;  %v1470_v63 = vld [vmem:[#allocation11 + $0x20] sm:$0xff] }
 0x3b1   : > { %1267 = vmatpush1.bf16.msra.mxu1 %v2490_v1  ;;  %v1471_v1 = vld [vmem:[#allocation11 + $0x28] sm:$0xff] }
 0x3b2   : > { %1268 = vmatprep.subr.bf16.mxu1 %v2495_v3  ;;  %v2264_v3 = vpack.c.bf16 %v1471_v1, %v1470_v63 }
 0x3b5   : > { %1269 = vmatpush1.bf16.msra.mxu1 %v2493_v4  ;;  %v1488_v4 = vld [vmem:[#allocation11 + $0xb0] sm:$0xff] }
 0x3b6   : > { %1270 = vmatprep.subr.bf16.mxu1 %v2498_v5  ;;  %v1489_v5 = vld [vmem:[#allocation11 + $0xb8] sm:$0xff] }
 0x3b9   : > { %1271 = vmatpush1.bf16.msra.mxu1 %v2496_v6  ;;  %v2266_v6 = vpack.c.bf16 %v1489_v5, %v1488_v4 }
 0x3ba   : > { %1272 = vmatprep.subr.bf16.mxu1 %v2501_v7  ;;  %v1472_v7 = vld [vmem:[#allocation11 + $0x30] sm:$0xff] }
 0x3bd   : > { %1273 = vmatpush1.bf16.msra.mxu1 %v2499_v8  ;;  %v1473_v8 = vld [vmem:[#allocation11 + $0x38] sm:$0xff] }
 0x3be   : > { %1274 = vmatprep.subr.bf16.mxu1 %v2504_v9  ;;  %v2268_v9 = vpack.c.bf16 %v1473_v8, %v1472_v7  ;;  %v1570_v7 = vld [vmem:[#allocation13 + $0x8] sm:$0xff] }
 0x3c1   : > { %1275 = vmatpush1.bf16.msra.mxu1 %v2502_v10  ;;  %v1490_v10 = vld [vmem:[#allocation11 + $0xc0] sm:$0xff] }
 0x3c2   : > { %1276 = vmatprep.subr.bf16.mxu1 %v2507_v11  ;;  %v1491_v11 = vld [vmem:[#allocation11 + $0xc8] sm:$0xff] }
 0x3c5   : > { %1277 = vmatpush1.bf16.msra.mxu1 %v2505_v12  ;;  %v2270_v12 = vpack.c.bf16 %v1491_v11, %v1490_v10 }
 0x3c6   : > { %1385 = vmatprep.subr.bf16.mxu1 %v2510_v14  ;;  %v1475_v14 = vld [vmem:[#allocation11 + $0x48] sm:$0xff] }
 0x47b   : > { %v1087_v15 = vpop.f32.mrb[4].mxu1 }
 0x47c   : > { %v1088_v17 = vadd.f32 %v1087_v15, %v998_v51  ;;  %v2176_v18 = vpop.f32.mrb[5].mxu1  ;;  %v2258_v51 = vpack.c.bf16 %v1485_v49, %v1484_v48 }
 0x47d   : > { %v1090_v19 = vpop.f32.mrb[6].mxu1 }
 0x47e   : > { %v1101_v20 = vadd.f32 %v1960_v16, %v1088_v17  ;;  %v1091_v21 = vadd.f32 %v1090_v19, %v1001_v53  ;;  %v2177_v22 = vpop.f32.mrb[7].mxu1  ;;  %v1469_v53 = vld [vmem:[#allocation11 + $0x18] sm:$0xff]  ;;  %v1476_v19 = vld [vmem:[#allocation11 + $0x50] sm:$0xff] }
 0x47f   : > { %v2260_v54 = vpack.c.bf16 %v1469_v53, %v1468_v52  ;;  %v1493_v17 = vld [vmem:[#allocation11 + $0xd8] sm:$0xff]  ;;  %v1494_v22 = vld [vmem:[#allocation11 + $0xe0] sm:$0xff] }
 0x480   : > { %v1103_v23 = vmul.f32 0.01, %v1101_v20  ;;  %v1102_v24 = vadd.f32 %v1960_v16, %v1091_v21  ;;  %v1492_v16 = vld [vmem:[#allocation11 + $0xd0] sm:$0xff] }
 0x481   : > { %v2274_v18 = vpack.c.bf16 %v1493_v17, %v1492_v16  ;;  %v1574_v16 = vld [vmem:[#allocation13 + $0x28] sm:$0xff] }
 0x482   : > { %v1104_v25 = vmul.f32 0.01, %v1102_v24  ;;  %v1105_v26 = vmax.f32 %v1101_v20, %v1103_v23  ;;  %v1477_v20 = vld [vmem:[#allocation11 + $0x58] sm:$0xff]  ;;  %v1495_v23 = vld [vmem:[#allocation11 + $0xe8] sm:$0xff] }
 0x483   : > { %v2276_v21 = vpack.c.bf16 %v1477_v20, %v1476_v19  ;;  %v1576_v19 = vld [vmem:[#allocation13 + $0x38] sm:$0xff] }
 0x484   : > { %v1106_v27 = vmax.f32 %v1102_v24, %v1104_v25  ;;  %v2278_v24 = vpack.c.bf16 %v1495_v23, %v1494_v22  ;;  %v1478_v25 = vld [vmem:[#allocation11 + $0x60] sm:$0xff]  ;;  %v1578_v22 = vld [vmem:[#allocation13 + $0x48] sm:$0xff] }
 0x486   : > { %v1107_v29 = vpack.c.bf16 %v1106_v27, %v1105_v26  ;;  %v1479_v26 = vld [vmem:[#allocation11 + $0x68] sm:$0xff] }
 0x487   : > { %v2280_v27 = vpack.c.bf16 %v1479_v26, %v1478_v25  ;;  %v1581_v26 = vld [vmem:[#allocation13 + $0x60] sm:$0xff] }
 0x488   : > { %2179 = vmatpush3.bf16.msra.mxu0 %v1107_v29  ;;  %1295 = vmatmul.mubr.bf16.vlgmr.msra.gmra.mrb[8].mxu1 %v1107_v29  ;;  %v1497_v29 = vld [vmem:[#allocation11 + $0xf8] sm:$0xff] }
 0x489   : > { %1386 = vmatpush1.bf16.msra.mxu1 %v2508_v28  ;;  %1417 = vmatprep.mubr.bf16.mxu1 %v2862_v13  ;;  %v1474_v13 = vld [vmem:[#allocation11 + $0x40] sm:$0xff]  ;;  %v1496_v28 = vld [vmem:[#allocation11 + $0xf0] sm:$0xff] }
 0x48a   : > { %1387 = vmatprep.subr.bf16.mxu1 %v2513_v30  ;;  %2255 = vmatprep.subr.bf16.mxu0 %v2254_v46  ;;  %v2272_v15 = vpack.c.bf16 %v1475_v14, %v1474_v13  ;;  %v1480_v30 = vld [vmem:[#allocation11 + $0x70] sm:$0xff]  ;;  %v1572_v13 = vld [vmem:[#allocation13 + $0x18] sm:$0xff] }
 0x48b   : > { %2181 = vmatmul.mubr.msk.bf16.vlgmr.msra.gmra.mrb[16].mxu0 %vm629_vm1, %v3287_v2  ;;  %v2531_v2 = vld [vmem:[#allocation10 + $0x74] ss:$8 sps:$4 sm:$0xff]  }
 0x48c   : > { %2257 = vmatpush3.bf16.msra.mxu0 %v2256_v50 }
 0x48d   : > { %1388 = vmatpush1.bf16.msra.mxu1 %v2511_v31  ;;  %2259 = vmatprep.subr.bf16.mxu0 %v2258_v51  ;;  %v2282_v31 = vpack.c.bf16 %v1497_v29, %v1496_v28  ;;  %v1583_v29 = vld [vmem:[#allocation13 + $0x70] sm:$0xff] }
 0x48e   : > { %1389 = vmatprep.subr.bf16.mxu1 %v2516_v32  ;;  %v1481_v32 = vld [vmem:[#allocation11 + $0x78] sm:$0xff] }
 0x490   : > { %2261 = vmatpush3.bf16.msra.mxu0 %v2260_v54 }
 0x491   : > { %1390 = vmatpush1.bf16.msra.mxu1 %v2514_v33  ;;  %2263 = vmatprep.subr.bf16.mxu0 %v2262_v62  ;;  %v2284_v33 = vpack.c.bf16 %v1481_v32, %v1480_v30  ;;  %v1584_v30 = vld [vmem:[#allocation13 + $0x78] sm:$0xff]  ;;  %v1658_v32 = vld [vmem:[#allocation14] sm:$0xff] }
 0x492   : > { %1391 = vmatprep.subr.bf16.mxu1 %v2519_v34  ;;  %v2863_v34 = vmov 0.0|0.0  }
 0x494   : > { %2265 = vmatpush3.bf16.msra.mxu0 %v2264_v3 }
 0x495   : > { %1392 = vmatpush1.bf16.msra.mxu1 %v2517_v35  ;;  %2267 = vmatprep.subr.bf16.mxu0 %v2266_v6  ;;  %v1430_v35 = vlaneseq  ;;  %v1569_v6 = vld [vmem:[#allocation13] sm:$0xff] }
 0x496   : > { %1393 = vmatprep.subr.bf16.mxu1 %v2522_v36  ;;  %v2287_v10 = vpack.c.bf16 %v1570_v7, %v1569_v6 }
 0x497   : > { %v1431_v36 = vshrl.u32 %v1430_v35, 7  ;;  %v1660_v35 = vld [vmem:[#allocation14 + $0x10] sm:$0xff] }
 0x498   : > { %2269 = vmatpush3.bf16.msra.mxu0 %v2268_v9 }
 0x499   : > { %1394 = vmatpush1.bf16.msra.mxu1 %v2520_v37  ;;  %2271 = vmatprep.subr.bf16.mxu0 %v2270_v12  ;;  %v1432_v37 = vsub.s32 0, %v1431_v36  ;;  %v1571_v12 = vld [vmem:[#allocation13 + $0x10] sm:$0xff] }
 0x49a   : > { %1395 = vmatprep.subr.bf16.mxu1 %v2525_v38  ;;  %v1428_v38 = vld [vmem:[%s3479_s6] sm:$0x3]  ;;  %v2290_v14 = vpack.c.bf16 %v1572_v13, %v1571_v12  ;;  %s1747_s6 = scalar_lea.sflag [#allocation4], %s3252_s23 }
 0x49c   : > { %2273 = vmatpush3.bf16.msra.mxu0 %v2272_v15  ;;  %v1573_v15 = vld [vmem:[#allocation13 + $0x20] sm:$0xff] }
 0x49d   : > { %1396 = vmatpush1.bf16.msra.mxu1 %v2523_v39  ;;  %2275 = vmatprep.subr.bf16.mxu0 %v2274_v18  ;;  %v1436_v39 = vsub.s32 1, %v1431_v36  ;;  %v2293_v17 = vpack.c.bf16 %v1574_v16, %v1573_v15  ;;  %v1575_v18 = vld [vmem:[#allocation13 + $0x30] sm:$0xff] }
 0x49e   : > { %1397 = vmatprep.subr.bf16.mxu1 %v2528_v40  ;;  %v1433_v40 = vrot.slane %v1428_v38, %v1432_v37  ;;  %v2296_v20 = vpack.c.bf16 %v1576_v19, %v1575_v18  ;;  %v1661_v37 = vld [vmem:[#allocation14 + $0x18] sm:$0xff] }
 0x4a0   : > { %2277 = vmatpush3.bf16.msra.mxu0 %v2276_v21  ;;  %v1577_v21 = vld [vmem:[#allocation13 + $0x40] sm:$0xff] }
 0x4a1   : > { %1398 = vmatpush1.bf16.msra.mxu1 %v2526_v41  ;;  %2279 = vmatprep.subr.bf16.mxu0 %v2278_v24  ;;  %v1437_v41 = vrot.slane %v1428_v38, %v1436_v39  ;;  %v2299_v23 = vpack.c.bf16 %v1578_v22, %v1577_v21  ;;  %v1580_v24 = vld [vmem:[#allocation13 + $0x58] sm:$0xff]  ;;  %v2314_v38 = vpack.c.bf16 %v1661_v37, %v1660_v35  ;;  %v1662_v39 = vld [vmem:[#allocation14 + $0x20] sm:$0xff] }
 0x4a2   : > { %1399 = vmatprep.subr.bf16.mxu1 %v2531_v2 }
 0x4a4   : > { %2281 = vmatpush3.bf16.msra.mxu0 %v2280_v27  ;;  %v1582_v27 = vld [vmem:[#allocation13 + $0x68] sm:$0xff] }
 0x4a5   : > { %1400 = vmatpush1.bf16.msra.mxu1 %v2529_v42  ;;  %2283 = vmatprep.subr.bf16.mxu0 %v2282_v31  ;;  %v2305_v28 = vpack.c.bf16 %v1582_v27, %v1581_v26  ;;  %v2308_v31 = vpack.c.bf16 %v1584_v30, %v1583_v29 }
 0x4a6   : > { %2310 = vmatprep.subr.bf16.mxu1 %v2863_v34 }
 0x4a8   : > { %2285 = vmatpush3.bf16.msra.mxu0 %v2284_v33  ;;  %v1659_v33 = vld [vmem:[#allocation14 + $0x8] sm:$0xff] }
 0x4a9   : > { %2286 = vmatprep.subr.bf16.mxu0 %v2863_v34  ;;  %v2311_v36 = vpack.c.bf16 %v1659_v33, %v1658_v32 }
 0x55e   : > { %v1142_v55 = vpop.f32.mrb[16].mxu0 }
 0x55f   : > { %v2182_v56 = vpop.f32.mrb[17].mxu0 }
 0x560   : > { %v1145_v57 = vpop.f32.mrb[18].mxu0 }
 0x561   : > { %v1149_v58 = vpack.c.bf16 %v1145_v57, %v1142_v55  ;;  %v2183_v59 = vpop.f32.mrb[19].mxu0 }
 0x563   : > { %1418 = vmatmul.mubr.bf16.vlgmr.msra.gmra.mrb[8].mxu1 %v1149_v58 }
 0x564   : > { %2251 = vmatprep.mubr.msk.f32.mxu1 %vm2861_vm0, %v2860_v0  ;;  %2312 = vmatpush3.bf16.msra.mxu1 %v2311_v36 }
 0x565   : > { %2313 = vmatprep.subr.bf16.mxu1 %v2863_v34 }
 0x568   : > { %2315 = vmatpush3.bf16.msra.mxu1 %v2314_v38 }
 0x569   : > { %2316 = vmatprep.subr.bf16.mxu1 %v2863_v34 }
 0x636   : > { %v1419_v2 = vpop.f32.mrb[8].mxu1 }
 0x637   : > { %v1440_v42 = vadd.f32 %v1433_v40, %v1419_v2  ;;  %v1421_v43 = vpop.f32.mrb[9].mxu1  ;;  %v1664_v2 = vld [vmem:[#allocation14 + $0x30] sm:$0xff] }
 0x638   : > { %v1441_v44 = vadd.f32 %v1437_v41, %v1421_v43  ;;  %v1423_v45 = vpop.f32.mrb[10].mxu1 }
 0x639   : > { %v1444_v46 = vmul.f32 0.01, %v1440_v42  ;;  %v1442_v47 = vadd.f32 %v1433_v40, %v1423_v45  ;;  %v1425_v48 = vpop.f32.mrb[11].mxu1  ;;  %v1663_v40 = vld [vmem:[#allocation14 + $0x28] sm:$0xff] }
 0x63a   : > { %v1445_v49 = vmul.f32 0.01, %v1441_v44  ;;  %v1443_v50 = vadd.f32 %v1437_v41, %v1425_v48  ;;  %v2317_v41 = vpack.c.bf16 %v1663_v40, %v1662_v39  ;;  %v1667_v45 = vld [vmem:[#allocation14 + $0x48] sm:$0xff]  ;;  %v1669_v48 = vld [vmem:[#allocation14 + $0x58] sm:$0xff] }
 0x63b   : > { %v1446_v51 = vmul.f32 0.01, %v1442_v47  ;;  %v1448_v53 = vmax.f32 %v1440_v42, %v1444_v46  ;;  %v1665_v42 = vld [vmem:[#allocation14 + $0x38] sm:$0xff] }
 0x63c   : > { %v1447_v52 = vmul.f32 0.01, %v1443_v50  ;;  %v1449_v55 = vmax.f32 %v1441_v44, %v1445_v49  ;;  %2318 = vmatpush3.bf16.msra.mxu1 %v2317_v41  ;;  %v2320_v43 = vpack.c.bf16 %v1665_v42, %v1664_v2  ;;  %v1666_v44 = vld [vmem:[#allocation14 + $0x40] sm:$0xff] }
 0x63d   : > { %v1450_v54 = vmax.f32 %v1442_v47, %v1446_v51  ;;  %2319 = vmatprep.subr.bf16.mxu1 %v2863_v34  ;;  %v2323_v46 = vpack.c.bf16 %v1667_v45, %v1666_v44  ;;  %v1668_v47 = vld [vmem:[#allocation14 + $0x50] sm:$0xff]  ;;  %v1498_v51 = vld [vmem:[%s3480_s0] sm:$0x1]  ;;  %s2766_s0 = scalar_lea.vmem %s2765_s24, 32 }
 0x63e   : > { %v1451_v56 = vmax.f32 %v1443_v50, %v1447_v52  ;;  %v2326_v49 = vpack.c.bf16 %v1669_v48, %v1668_v47  ;;  %p2768_p8 = scmp.lt.s32.totalorder %s2766_s0, %s2760_s28 }
 0x63f   : > { %v1452_v57 = vmax.f32 %v1448_v53, %v1450_v54 }
 0x640   : > { %v1459_v58 = vmax.f32 %v1449_v55, %v1451_v56  ;;  %2321 = vmatpush3.bf16.msra.mxu1 %v2320_v43  ;;  %v1670_v55 = vld [vmem:[#allocation14 + $0x60] sm:$0xff]  ;;  %v1671_v56 = vld [vmem:[#allocation14 + $0x68] sm:$0xff]  ;;  %p2769_p4 = por %p2768_p8, %p2767_p5 }
 0x641   : > { %v1453_v59 = vrot.slane %v1452_v57, 4  ;;  %2322 = vmatprep.subr.bf16.mxu1 %v2863_v34 }
 0x642   : > { %v1460_v60 = vrot.slane %v1459_v58, 4  ;;  %p2770_p3 = pnand %p2769_p4, %p2763_p2 }
 0x643   : > { %v1454_v61 = vmax.f32 %v1452_v57, %v1453_v59  ;;  %v2329_v57 = vpack.c.bf16 %v1671_v56, %v1670_v55  ;;  %v1673_v59 = vld [vmem:[#allocation14 + $0x78] sm:$0xff] }
 0x644   : > { %v1461_v62 = vmax.f32 %v1459_v58, %v1460_v60  ;;  %2324 = vmatpush3.bf16.msra.mxu1 %v2323_v46  ;;  %v1672_v58 = vld [vmem:[#allocation14 + $0x70] sm:$0xff] }
 0x645   : > { %v1455_v63 = vrot.slane %v1454_v61, 2  ;;  %2325 = vmatprep.subr.bf16.mxu1 %v2863_v34  ;;  %v2332_v60 = vpack.c.bf16 %v1673_v59, %v1672_v58 }
 0x646   : > { %v1462_v1 = vrot.slane %v1461_v62, 2 }
 0x647   : > { %v1456_v3 = vmax.f32 %v1454_v61, %v1455_v63  ;;  %v1585_v61 = vld [vmem:[%s3481_s8] sm:$0x1] }
 0x648   : > { %v1463_v4 = vmax.f32 %v1461_v62, %v1462_v1  ;;  %2327 = vmatpush3.bf16.msra.mxu1 %v2326_v49 }
 0x649   : > { %v1457_v5 = vrot.slane %v1456_v3, 1  ;;  %2328 = vmatprep.subr.bf16.mxu1 %v2863_v34 }
 0x64a   : > { %v1464_v8 = vrot.slane %v1463_v4, 1 }
 0x64b   : > { %v1458_v11 = vmax.f32 %v1456_v3, %v1457_v5 }
 0x64c   : > { %v1465_v9 = vmax.f32 %v1463_v4, %v1464_v8  ;;  %2330 = vmatpush3.bf16.msra.mxu1 %v2329_v57 }
 0x64d   : > { %2331 = vmatprep.subr.bf16.mxu1 %v2863_v34 }
 0x64e   : > { %1563 = vmatprep.mubr.f32.mxu0 %v1465_v9 }
 0x64f   : > { %1564 = vmatmul.mubr.f32.vlgmr.msra.gmra.mrb[20].mxu0 %v1458_v11 }
 0x650   : > { %2288 = vmatpush3.bf16.msra.mxu0 %v2287_v10  ;;  %2216 = vmatprep.mubr.msk.f32.mxu0 %vm2861_vm0, %v2860_v0  ;;  %v1579_v0 = vld [vmem:[#allocation13 + $0x50] sm:$0xff] }
 0x651   : > { %2289 = vmatprep.subr.bf16.mxu0 %v2863_v34  ;;  %v2302_v25 = vpack.c.bf16 %v1580_v24, %v1579_v0  ;;  %2333 = vmatpush3.bf16.msra.mxu1 %v2332_v60 }
 0x654   : > { %2291 = vmatpush3.bf16.msra.mxu0 %v2290_v14 }
 0x655   : > { %2292 = vmatprep.subr.bf16.mxu0 %v2863_v34 }
 0x658   : > { %2294 = vmatpush3.bf16.msra.mxu0 %v2293_v17 }
 0x659   : > { %2295 = vmatprep.subr.bf16.mxu0 %v2863_v34 }
 0x65c   : > { %2297 = vmatpush3.bf16.msra.mxu0 %v2296_v20 }
 0x65d   : > { %2298 = vmatprep.subr.bf16.mxu0 %v2863_v34 }
 0x660   : > { %2300 = vmatpush3.bf16.msra.mxu0 %v2299_v23 }
 0x661   : > { %2301 = vmatprep.subr.bf16.mxu0 %v2863_v34 }
 0x664   : > { %2303 = vmatpush3.bf16.msra.mxu0 %v2302_v25 }
 0x665   : > { %2304 = vmatprep.subr.bf16.mxu0 %v2863_v34 }
 0x668   : > { %2306 = vmatpush3.bf16.msra.mxu0 %v2305_v28 }
 0x669   : > { %2307 = vmatprep.subr.bf16.mxu0 %v2863_v34  ;;  %v1674_v34 = vld [vmem:[%s3482_s20] sm:$0x1] }
 0x66c   : > { %2309 = vmatpush3.bf16.msra.mxu0 %v2308_v31 }
 0x722   : > { %v2065_v50 = vpop.f32.mrb[20].mxu0 }
 0x723   : > { %v2066_v52 = vpop.f32.mrb[21].mxu0 }
 0x724   : > { %v2067_v53 = vadd.f32 %v2066_v52, %v2065_v50 }
 0x726   : > { %v1566_v54 = vadd.f32 %v2067_v53, %v1498_v51 }
 0x728   : > { %2217 = vmatmul.mubr.f32.vlgmr.msra.gmra.mrb[22].mxu0 %v1566_v54 }
 0x7fb   : > { %v1652_v62 = vpop.f32.mrb[22].mxu0 }
 0x7fc   : > { %v1653_v63 = vadd.f32 %v1652_v62, %v1585_v61  ;;  %v2218_v1 = vpop.f32.mrb[23].mxu0 }
 0x7fe   : > { %v1656_v3 = vmul.f32 0.01, %v1653_v63 }
 0x800   : > { %v1657_v4 = vmax.f32 %v1653_v63, %v1656_v3 }
 0x802   : > { %2252 = vmatmul.mubr.f32.vlgmr.msra.gmra.mrb[12].mxu1 %v1657_v4 }
 0x8d5   : > { %v1741_v5 = vpop.f32.mrb[12].mxu1 }
 0x8d6   : > { %v1742_v6 = vadd.f32 %v1741_v5, %v1674_v34  ;;  %v2253_v7 = vpop.f32.mrb[13].mxu1 }
 0x8d8   : > { %1745 = vst [vmem:[%s611_s11] sm:$0x1] %v1742_v6 }
 0x8d9   : > { %2773 = shalt.err (!%p2770_p3)
}
 0x8da   : > { %s2774_s23 = scalar_lea.hbm %s3375_s9, 16  ;;  %s2778_s8 = scalar_lea.hbm %s3483_s13, 32 }
 0x8db   : > { %p2775_p10 = scmp.ne.s32.totalorder %s3375_s9, %s2774_s23  ;;  %p2779_p12 = scmp.lt.u32.totalorder %s3375_s9, %s3483_s13 }
 0x8dc   : > { %p2780_p6 = scmp.lt.u32.totalorder %s2778_s8, %s2774_s23  ;;  %p2782_p7 = scmp.lt.u32.totalorder %s2774_s23, %s3375_s9 }
 0x8dd   : > { %p2776_p1 = pnand %p2775_p10, %p3484_p9 }
 0x8de   : > { %p2781_p13 = por %p2780_p6, %p2779_p12 }
 0x8df   : > { %p2777_p11 = pneg %p2776_p1 }
 0x8e0   : > { %p2783_p0 = por %p2782_p7, %p2781_p13 }
 0x8e2   : > { %p2784_p2 = pnand %p2783_p0, %p2777_p11 }
 0x8e4   : > { %2787 = shalt.err (!%p2784_p2)
}
 0x8e5   : > { %2366 = dma.vmem_to_hbm [thread:$0]  (%p3484_p9), %s3377_s17, 16, %s3375_s9, %s1747_s6  }
 0x8e6 PF: > { %s1771_s20 = sand.u32 1, %s2834_s29   ;;  %p3485_p5 = scmp.ne.s32.totalorder %s3464_s26, 0 }
 0x8e7   : > { %p3486_p8 = scmp.ge.s32.totalorder %s2846_s16, 2  ;;  %s1772_s22 = scalar_lea.sflag [#allocation4], %s1771_s20 }
 0x8e9   : > { %p2395_p4 = pnand %p3486_p8, %p3485_p5 }
 0x8eb   : > { %2829 = dma.done.wait (!%p2395_p4), %s1772_s22, 16  }
 0x8ec   : > { %2831 = vsyncadd (!%p2395_p4), %s1772_s22, 4294967280  ;;  %p33_p3 = scmp.ge.s32.totalorder %s3130_s21, 4   ;;  %s3487_s29 = smov %s2838_s30 }
 0x8ed   : > { %s3488_s30 = smov %s2842_s15  ;;  %s3489_s15 = smov %s3141_s25 }
 0x8ee   : > { %s3490_s16 = smov %s3130_s21  ;;  %35 = sbr.rel (!%p33_p3) target bundleno = 22 (0x16), region = 158 }
 0x8f5   :  { %1776 = vsyncpa [#allocation3], 1 }
 0x8f6   :  { %1778 = vsyncpa [#allocation3 + $0x1], 1 }
 0x8f7   :  { %1779 = vsyncpa [#allocation6], 1 }
 0x8f8   :  { %1781 = vsyncpa [#allocation6 + $0x1], 1 }
 0x8f9   :  { %1782 = vsyncpa [#allocation9], 1 }
 0x8fa   :  { %1783 = vsyncpa [#allocation12], 1 }
 0x8fb   :  { %1784 = vsyncpa [#allocation15], 1 }
 0x8fc   :  { %1785 = vsyncpa [#allocation4], 1 }
 0x8fd   :  { %1787 = vsyncpa [#allocation4 + $0x1], 1 }

</bundles_post_ra>
